<compile_context>
chip_gen: v5e
topology: v5e:2x2
jax: 0.10.0
libtpu: 0.0.40
codegen_flags: <defaults>
</compile_context>

<pallas_src>
import functools

import jax
import jax.numpy as jnp
from jax.experimental import pallas as pl
from jax.experimental.pallas import tpu as pltpu

CP = 8  # channel dim padded to one f32 sublane tile


# ------------------------------ fused kernel -------------------------------
def _final_net_kernel(x_ref, mask_ref, w1_ref, w2_ref, w3_ref, w4_ref,
                      o_ref, col_ref, *, W, scale):
    # x_ref   : (CP, N*HW) f32   activations, channels 0..3 real, 4..7 zero
    # mask_ref: (9*CP, N*HW) f32 per-tap zero-'same'-padding masks (per image)
    # w*_ref  : (CP, 10*CP) bf16 im2col weights, bias folded at column 9*CP
    # o_ref   : (CP, N*HW) f32
    # col_ref : (10*CP, N*HW) bf16 VMEM im2col scratch (reused by all 4 convs)
    NHW = x_ref.shape[1]
    offsets = [(oy, ox) for oy in (-1, 0, 1) for ox in (-1, 0, 1)]

    # Constant "ones" block (sublane 0 = 1) -> bias column of the matmul.
    ones_block = jnp.where(
        jax.lax.broadcasted_iota(jnp.int32, (CP, NHW), 0) == 0,
        jnp.float32(1.0), jnp.float32(0.0))

    def conv3x3(act, w_ref):
        # Assemble the (80, NHW) im2col tile from lane rotations (XLU) + resident
        # masks (one VPU mul per tap), then contract with ONE bf16 MXU matmul.
        taps = []
        for t, (oy, ox) in enumerate(offsets):
            delta = oy * W + ox                       # flat offset of the tap
            tap = act if delta == 0 else pltpu.roll(act, shift=(-delta) % NHW, axis=1)
            taps.append(tap * mask_ref[t * CP:(t + 1) * CP, :])   # zero padding
        taps.append(ones_block)                                    # bias row block
        # 16-row paired stores -> full, unmasked bf16 tile stores.
        for p in range(5):
            col_ref[2 * p * CP:(2 * p + 2) * CP, :] = jnp.concatenate(
                [taps[2 * p], taps[2 * p + 1]], axis=0).astype(jnp.bfloat16)
        return jnp.dot(w_ref[...], col_ref[...],
                       preferred_element_type=jnp.float32)         # (CP, NHW) f32

    x0 = x_ref[...].astype(jnp.float32)
    # remove_model proxy: conv -> relu -> conv
    h = jnp.maximum(conv3x3(x0, w1_ref), 0.0)
    xr = conv3x3(h, w2_ref)
    # enhancement_model proxy: conv -> relu -> conv
    h2 = jnp.maximum(conv3x3(xr, w3_ref), 0.0)
    enh = conv3x3(h2, w4_ref)
    # blend: (enh*scale + xr) / (1+scale), divide folded into a constant multiply
    inv = 1.0 / (1.0 + scale)
    o_ref[...] = ((enh * scale + xr) * inv).astype(o_ref.dtype)


# ------------------------------- wrapper -----------------------------------
def _im2col_weight(w, b, C):
    # (3,3,Cin,Cout) -> (CP, 9*CP + CP) bf16, rows/cols zero-padded to 8-channel
    # blocks, bias folded into column 9*CP (matches the in-kernel ones row).
    kh, kw, cin, cout = w.shape
    w2 = jnp.transpose(w, (3, 0, 1, 2)).reshape(cout, kh * kw, cin)
    wpad = jnp.zeros((CP, kh * kw, CP), jnp.float32).at[:cout, :, :cin].set(w2)
    wflat = wpad.reshape(CP, kh * kw * CP)
    bias_block = jnp.zeros((CP, CP), jnp.float32).at[:cout, 0].set(b)
    return jnp.concatenate([wflat, bias_block], axis=1).astype(jnp.bfloat16)


def _pad_masks(N, H, W):
    # (9*CP, N*HW) f32 validity masks implementing zero 'same' padding; built
    # from the PER-IMAGE index (pos % HW) so taps never leak across the batch seam.
    HW = H * W
    pos = jnp.arange(N * HW, dtype=jnp.int32) % HW
    row, col = pos // W, pos % W
    blocks = []
    for oy in (-1, 0, 1):
        for ox in (-1, 0, 1):
            ok = ((row + oy >= 0) & (row + oy < H) &
                  (col + ox >= 0) & (col + ox < W)).astype(jnp.float32)
            blocks.append(jnp.broadcast_to(ok[None, :], (CP, N * HW)))
    return jnp.concatenate(blocks, axis=0)


def final_net_forward(params, input_nchw, scale=0.05):
    N, C, H, W = input_nchw.shape
    HW, NHW = H * W, N * H * W

    # (N,C,H,W) -> (CP, N*HW): channels on sublanes (padded to 8), whole batch
    # folded onto the lane axis (lane-dense, multiple of 128 at this size).
    x2d = jnp.transpose(input_nchw, (1, 0, 2, 3)).reshape(C, NHW)
    x2d = jnp.zeros((CP, NHW), input_nchw.dtype).at[:C].set(x2d)

    ws = [_im2col_weight(params[wk], params[bk], C)
          for wk, bk in (("remove_w1", "remove_b1"), ("remove_w2", "remove_b2"),
                         ("enh_w1", "enh_b1"), ("enh_w2", "enh_b2"))]
    masks = _pad_masks(N, H, W)

    const2d = lambda i: (0, 0)
    kern = functools.partial(_final_net_kernel, W=W, scale=float(scale))
    out2d = pl.pallas_call(
        kern,
        out_shape=jax.ShapeDtypeStruct((CP, NHW), input_nchw.dtype),
        grid_spec=pltpu.PrefetchScalarGridSpec(
            num_scalar_prefetch=0,
            grid=(1,),  # whole (tiny) problem in one step; see row-strip TODO above
            in_specs=[pl.BlockSpec((CP, NHW), const2d),        # activations
                      pl.BlockSpec((9 * CP, NHW), const2d),    # padding masks
                      pl.BlockSpec((CP, 10 * CP), const2d),    # 4x weights (bias folded)
                      pl.BlockSpec((CP, 10 * CP), const2d),
                      pl.BlockSpec((CP, 10 * CP), const2d),
                      pl.BlockSpec((CP, 10 * CP), const2d)],
            out_specs=pl.BlockSpec((CP, NHW), const2d),
            scratch_shapes=[pltpu.VMEM((10 * CP, NHW), jnp.bfloat16)],
        ),
        compiler_params=pltpu.CompilerParams(
            dimension_semantics=("arbitrary",)),
    )(x2d, masks, *ws)

    return jnp.transpose(out2d[:C].reshape(C, N, H, W), (1, 0, 2, 3))


# ----------------------------- parameters ----------------------------------
def init_params(key, C):
    ks = jax.random.split(key, 8)

    def wgt(k, cin, cout):
        return 0.1 * jax.random.normal(k, (3, 3, cin, cout), jnp.float32)

    def bias(k, cout):
        return 0.01 * jax.random.normal(k, (cout,), jnp.float32)

    return {
        "remove_w1": wgt(ks[0], C, C), "remove_b1": bias(ks[1], C),
        "remove_w2": wgt(ks[2], C, C), "remove_b2": bias(ks[3], C),
        "enh_w1": wgt(ks[4], C, C), "enh_b1": bias(ks[5], C),
        "enh_w2": wgt(ks[6], C, C), "enh_b2": bias(ks[7], C),
    }


# -------------------------- pure-JAX reference ------------------------------
def _conv3x3_ref(x_nchw, w, b, relu):
    y = jax.lax.conv_general_dilated(
        x_nchw, w, window_strides=(1, 1), padding="SAME",
        dimension_numbers=("NCHW", "HWIO", "NCHW"))
    y = y + b.reshape(1, -1, 1, 1)
    return jnp.maximum(y, 0.0) if relu else y


def final_net_reference(params, x, scale=0.05):
    h = _conv3x3_ref(x, params["remove_w1"], params["remove_b1"], True)
    xr = _conv3x3_ref(h, params["remove_w2"], params["remove_b2"], False)
    h2 = _conv3x3_ref(xr, params["enh_w1"], params["enh_b1"], True)
    enh = _conv3x3_ref(h2, params["enh_w2"], params["enh_b2"], False)
    return (enh * scale + xr) / (1.0 + scale)


# ---------------------------------- main ------------------------------------
if __name__ == "__main__":
    key = jax.random.PRNGKey(0)
    k_in, k_p = jax.random.split(key)

    N, C, H, W = 2, 4, 16, 16
    x = jax.random.normal(k_in, (N, C, H, W), jnp.float32)    # PyTorch NCHW input
    params = init_params(k_p, C)

    out = jax.jit(final_net_forward)(params, x)
    jax.block_until_ready(out)
    assert out.shape == (N, C, H, W)
    assert out.dtype == jnp.float32

    # Correctness vs an XLA reference; tolerance is loose because the kernel
    # feeds the MXU bf16 (and the f32 reference itself uses DEFAULT precision).
    ref = final_net_reference(params, x)
    err = float(jnp.max(jnp.abs(out - ref)))
    assert err < 5e-2, f"max |err| = {err}"
    print("KERNEL_OK")
</pallas_src>

<mosaic_0001>
module attributes {stable_mosaic.version = 11 : i64} {
  func.func @_final_net_kernel(%arg0: i32, %arg1: memref<8x512xf32, #tpu.memory_space<vmem>>, %arg2: memref<72x512xf32, #tpu.memory_space<vmem>>, %arg3: memref<8x80xbf16, #tpu.memory_space<vmem>>, %arg4: memref<8x80xbf16, #tpu.memory_space<vmem>>, %arg5: memref<8x80xbf16, #tpu.memory_space<vmem>>, %arg6: memref<8x80xbf16, #tpu.memory_space<vmem>>, %arg7: memref<8x512xf32, #tpu.memory_space<vmem>>, %arg8: memref<80x512xbf16, #tpu.memory_space<vmem>>) attributes {dimension_semantics = [#tpu.dimension_semantics<arbitrary>], iteration_bounds = array<i64: 1>, scalar_prefetch = 0 : i64, scratch_operands = 1 : i64, tpu.core_type = #tpu.core_type<tc>, window_params = [{pipeline_mode = #tpu.pipeline_mode<synchronous>, transform_indices = @transform_0, window_bounds = array<i64: 8, 512>}, {pipeline_mode = #tpu.pipeline_mode<synchronous>, transform_indices = @transform_1, window_bounds = array<i64: 72, 512>}, {pipeline_mode = #tpu.pipeline_mode<synchronous>, transform_indices = @transform_2, window_bounds = array<i64: 8, 80>}, {pipeline_mode = #tpu.pipeline_mode<synchronous>, transform_indices = @transform_3, window_bounds = array<i64: 8, 80>}, {pipeline_mode = #tpu.pipeline_mode<synchronous>, transform_indices = @transform_4, window_bounds = array<i64: 8, 80>}, {pipeline_mode = #tpu.pipeline_mode<synchronous>, transform_indices = @transform_5, window_bounds = array<i64: 8, 80>}, {pipeline_mode = #tpu.pipeline_mode<synchronous>, transform_indices = @transform_6, window_bounds = array<i64: 8, 512>}]} {
    %0 = tpu.iota {dimensions = array<i32: 0>} : vector<8x512xi32>
    %c0_i32 = arith.constant 0 : i32
    %1 = vector.broadcast %c0_i32 : i32 to vector<8x512xi32>
    %2 = arith.cmpi eq, %0, %1 : vector<8x512xi32>
    %cst = arith.constant 1.000000e+00 : f32
    %cst_0 = arith.constant 0.000000e+00 : f32
    %3 = vector.broadcast %cst : f32 to vector<8x512xf32>
    %4 = vector.broadcast %cst_0 : f32 to vector<8x512xf32>
    %5 = arith.select %2, %3, %4 : vector<8x512xi1>, vector<8x512xf32>
    %c0 = arith.constant 0 : index
    %c0_1 = arith.constant 0 : index
    %6 = vector.load %arg1[%c0, %c0_1] : memref<8x512xf32, #tpu.memory_space<vmem>>, vector<8x512xf32>
    %c17_i32 = arith.constant 17 : i32
    %7 = tpu.dynamic_rotate %6 by %c17_i32 dim 1 : vector<8x512xf32>, i32 -> vector<8x512xf32>
    %c0_2 = arith.constant 0 : index
    %c0_3 = arith.constant 0 : index
    %8 = vector.load %arg2[%c0_2, %c0_3] : memref<72x512xf32, #tpu.memory_space<vmem>>, vector<8x512xf32>
    %9 = arith.mulf %7, %8 : vector<8x512xf32>
    %c16_i32 = arith.constant 16 : i32
    %10 = tpu.dynamic_rotate %6 by %c16_i32 dim 1 : vector<8x512xf32>, i32 -> vector<8x512xf32>
    %c8 = arith.constant 8 : index
    %c0_4 = arith.constant 0 : index
    %11 = vector.load %arg2[%c8, %c0_4] : memref<72x512xf32, #tpu.memory_space<vmem>>, vector<8x512xf32>
    %12 = arith.mulf %10, %11 : vector<8x512xf32>
    %c15_i32 = arith.constant 15 : i32
    %13 = tpu.dynamic_rotate %6 by %c15_i32 dim 1 : vector<8x512xf32>, i32 -> vector<8x512xf32>
    %c16 = arith.constant 16 : index
    %c0_5 = arith.constant 0 : index
    %14 = vector.load %arg2[%c16, %c0_5] : memref<72x512xf32, #tpu.memory_space<vmem>>, vector<8x512xf32>
    %15 = arith.mulf %13, %14 : vector<8x512xf32>
    %c1_i32 = arith.constant 1 : i32
    %16 = tpu.dynamic_rotate %6 by %c1_i32 dim 1 : vector<8x512xf32>, i32 -> vector<8x512xf32>
    %c24 = arith.constant 24 : index
    %c0_6 = arith.constant 0 : index
    %17 = vector.load %arg2[%c24, %c0_6] : memref<72x512xf32, #tpu.memory_space<vmem>>, vector<8x512xf32>
    %18 = arith.mulf %16, %17 : vector<8x512xf32>
    %c32 = arith.constant 32 : index
    %c0_7 = arith.constant 0 : index
    %19 = vector.load %arg2[%c32, %c0_7] : memref<72x512xf32, #tpu.memory_space<vmem>>, vector<8x512xf32>
    %20 = arith.mulf %6, %19 : vector<8x512xf32>
    %c511_i32 = arith.constant 511 : i32
    %21 = tpu.dynamic_rotate %6 by %c511_i32 dim 1 : vector<8x512xf32>, i32 -> vector<8x512xf32>
    %c40 = arith.constant 40 : index
    %c0_8 = arith.constant 0 : index
    %22 = vector.load %arg2[%c40, %c0_8] : memref<72x512xf32, #tpu.memory_space<vmem>>, vector<8x512xf32>
    %23 = arith.mulf %21, %22 : vector<8x512xf32>
    %c497_i32 = arith.constant 497 : i32
    %24 = tpu.dynamic_rotate %6 by %c497_i32 dim 1 : vector<8x512xf32>, i32 -> vector<8x512xf32>
    %c48 = arith.constant 48 : index
    %c0_9 = arith.constant 0 : index
    %25 = vector.load %arg2[%c48, %c0_9] : memref<72x512xf32, #tpu.memory_space<vmem>>, vector<8x512xf32>
    %26 = arith.mulf %24, %25 : vector<8x512xf32>
    %c496_i32 = arith.constant 496 : i32
    %27 = tpu.dynamic_rotate %6 by %c496_i32 dim 1 : vector<8x512xf32>, i32 -> vector<8x512xf32>
    %c56 = arith.constant 56 : index
    %c0_10 = arith.constant 0 : index
    %28 = vector.load %arg2[%c56, %c0_10] : memref<72x512xf32, #tpu.memory_space<vmem>>, vector<8x512xf32>
    %29 = arith.mulf %27, %28 : vector<8x512xf32>
    %c495_i32 = arith.constant 495 : i32
    %30 = tpu.dynamic_rotate %6 by %c495_i32 dim 1 : vector<8x512xf32>, i32 -> vector<8x512xf32>
    %c64 = arith.constant 64 : index
    %c0_11 = arith.constant 0 : index
    %31 = vector.load %arg2[%c64, %c0_11] : memref<72x512xf32, #tpu.memory_space<vmem>>, vector<8x512xf32>
    %32 = arith.mulf %30, %31 : vector<8x512xf32>
    %33 = tpu.concatenate %9, %12 in 0 : vector<8x512xf32>, vector<8x512xf32> -> vector<16x512xf32>
    %34 = arith.truncf %33 : vector<16x512xf32> to vector<16x512xbf16>
    %c0_12 = arith.constant 0 : index
    %c0_13 = arith.constant 0 : index
    %35 = vector.load %arg8[%c0_12, %c0_13] : memref<80x512xbf16, #tpu.memory_space<vmem>>, vector<16x512xbf16>
    tpu.vector_store %arg8[%c0_12, %c0_13], %34 {strides = array<i32>} : memref<80x512xbf16, #tpu.memory_space<vmem>>, vector<16x512xbf16>,
    %36 = tpu.concatenate %15, %18 in 0 : vector<8x512xf32>, vector<8x512xf32> -> vector<16x512xf32>
    %37 = arith.truncf %36 : vector<16x512xf32> to vector<16x512xbf16>
    %c16_14 = arith.constant 16 : index
    %c0_15 = arith.constant 0 : index
    %38 = vector.load %arg8[%c16_14, %c0_15] : memref<80x512xbf16, #tpu.memory_space<vmem>>, vector<16x512xbf16>
    tpu.vector_store %arg8[%c16_14, %c0_15], %37 {strides = array<i32>} : memref<80x512xbf16, #tpu.memory_space<vmem>>, vector<16x512xbf16>,
    %39 = tpu.concatenate %20, %23 in 0 : vector<8x512xf32>, vector<8x512xf32> -> vector<16x512xf32>
    %40 = arith.truncf %39 : vector<16x512xf32> to vector<16x512xbf16>
    %c32_16 = arith.constant 32 : index
    %c0_17 = arith.constant 0 : index
    %41 = vector.load %arg8[%c32_16, %c0_17] : memref<80x512xbf16, #tpu.memory_space<vmem>>, vector<16x512xbf16>
    tpu.vector_store %arg8[%c32_16, %c0_17], %40 {strides = array<i32>} : memref<80x512xbf16, #tpu.memory_space<vmem>>, vector<16x512xbf16>,
    %42 = tpu.concatenate %26, %29 in 0 : vector<8x512xf32>, vector<8x512xf32> -> vector<16x512xf32>
    %43 = arith.truncf %42 : vector<16x512xf32> to vector<16x512xbf16>
    %c48_18 = arith.constant 48 : index
    %c0_19 = arith.constant 0 : index
    %44 = vector.load %arg8[%c48_18, %c0_19] : memref<80x512xbf16, #tpu.memory_space<vmem>>, vector<16x512xbf16>
    tpu.vector_store %arg8[%c48_18, %c0_19], %43 {strides = array<i32>} : memref<80x512xbf16, #tpu.memory_space<vmem>>, vector<16x512xbf16>,
    %45 = tpu.concatenate %32, %5 in 0 : vector<8x512xf32>, vector<8x512xf32> -> vector<16x512xf32>
    %46 = arith.truncf %45 : vector<16x512xf32> to vector<16x512xbf16>
    %c64_20 = arith.constant 64 : index
    %c0_21 = arith.constant 0 : index
    %47 = vector.load %arg8[%c64_20, %c0_21] : memref<80x512xbf16, #tpu.memory_space<vmem>>, vector<16x512xbf16>
    tpu.vector_store %arg8[%c64_20, %c0_21], %46 {strides = array<i32>} : memref<80x512xbf16, #tpu.memory_space<vmem>>, vector<16x512xbf16>,
    %c0_22 = arith.constant 0 : index
    %c0_23 = arith.constant 0 : index
    %48 = vector.load %arg3[%c0_22, %c0_23] : memref<8x80xbf16, #tpu.memory_space<vmem>>, vector<8x80xbf16>
    %c0_24 = arith.constant 0 : index
    %c0_25 = arith.constant 0 : index
    %49 = vector.load %arg8[%c0_24, %c0_25] : memref<80x512xbf16, #tpu.memory_space<vmem>>, vector<80x512xbf16>
    %cst_26 = arith.constant dense<0.000000e+00> : vector<8x512xf32>
    %50 = tpu.matmul %48, %49, %cst_26 {dimension_numbers = #tpu.dot_dimension_numbers<[1], [0], [0], [1], [0, 0, 1, 1], [], []>} : vector<8x80xbf16>, vector<80x512xbf16>, vector<8x512xf32> -> vector<8x512xf32>
    %cst_27 = arith.constant 0.000000e+00 : f32
    %51 = vector.broadcast %cst_27 : f32 to vector<8x512xf32>
    %52 = arith.maximumf %50, %51 : vector<8x512xf32>
    %c17_i32_28 = arith.constant 17 : i32
    %53 = tpu.dynamic_rotate %52 by %c17_i32_28 dim 1 : vector<8x512xf32>, i32 -> vector<8x512xf32>
    %c0_29 = arith.constant 0 : index
    %c0_30 = arith.constant 0 : index
    %54 = vector.load %arg2[%c0_29, %c0_30] : memref<72x512xf32, #tpu.memory_space<vmem>>, vector<8x512xf32>
    %55 = arith.mulf %53, %54 : vector<8x512xf32>
    %c16_i32_31 = arith.constant 16 : i32
    %56 = tpu.dynamic_rotate %52 by %c16_i32_31 dim 1 : vector<8x512xf32>, i32 -> vector<8x512xf32>
    %c8_32 = arith.constant 8 : index
    %c0_33 = arith.constant 0 : index
    %57 = vector.load %arg2[%c8_32, %c0_33] : memref<72x512xf32, #tpu.memory_space<vmem>>, vector<8x512xf32>
    %58 = arith.mulf %56, %57 : vector<8x512xf32>
    %c15_i32_34 = arith.constant 15 : i32
    %59 = tpu.dynamic_rotate %52 by %c15_i32_34 dim 1 : vector<8x512xf32>, i32 -> vector<8x512xf32>
    %c16_35 = arith.constant 16 : index
    %c0_36 = arith.constant 0 : index
    %60 = vector.load %arg2[%c16_35, %c0_36] : memref<72x512xf32, #tpu.memory_space<vmem>>, vector<8x512xf32>
    %61 = arith.mulf %59, %60 : vector<8x512xf32>
    %c1_i32_37 = arith.constant 1 : i32
    %62 = tpu.dynamic_rotate %52 by %c1_i32_37 dim 1 : vector<8x512xf32>, i32 -> vector<8x512xf32>
    %c24_38 = arith.constant 24 : index
    %c0_39 = arith.constant 0 : index
    %63 = vector.load %arg2[%c24_38, %c0_39] : memref<72x512xf32, #tpu.memory_space<vmem>>, vector<8x512xf32>
    %64 = arith.mulf %62, %63 : vector<8x512xf32>
    %c32_40 = arith.constant 32 : index
    %c0_41 = arith.constant 0 : index
    %65 = vector.load %arg2[%c32_40, %c0_41] : memref<72x512xf32, #tpu.memory_space<vmem>>, vector<8x512xf32>
    %66 = arith.mulf %52, %65 : vector<8x512xf32>
    %c511_i32_42 = arith.constant 511 : i32
    %67 = tpu.dynamic_rotate %52 by %c511_i32_42 dim 1 : vector<8x512xf32>, i32 -> vector<8x512xf32>
    %c40_43 = arith.constant 40 : index
    %c0_44 = arith.constant 0 : index
    %68 = vector.load %arg2[%c40_43, %c0_44] : memref<72x512xf32, #tpu.memory_space<vmem>>, vector<8x512xf32>
    %69 = arith.mulf %67, %68 : vector<8x512xf32>
    %c497_i32_45 = arith.constant 497 : i32
    %70 = tpu.dynamic_rotate %52 by %c497_i32_45 dim 1 : vector<8x512xf32>, i32 -> vector<8x512xf32>
    %c48_46 = arith.constant 48 : index
    %c0_47 = arith.constant 0 : index
    %71 = vector.load %arg2[%c48_46, %c0_47] : memref<72x512xf32, #tpu.memory_space<vmem>>, vector<8x512xf32>
    %72 = arith.mulf %70, %71 : vector<8x512xf32>
    %c496_i32_48 = arith.constant 496 : i32
    %73 = tpu.dynamic_rotate %52 by %c496_i32_48 dim 1 : vector<8x512xf32>, i32 -> vector<8x512xf32>
    %c56_49 = arith.constant 56 : index
    %c0_50 = arith.constant 0 : index
    %74 = vector.load %arg2[%c56_49, %c0_50] : memref<72x512xf32, #tpu.memory_space<vmem>>, vector<8x512xf32>
    %75 = arith.mulf %73, %74 : vector<8x512xf32>
    %c495_i32_51 = arith.constant 495 : i32
    %76 = tpu.dynamic_rotate %52 by %c495_i32_51 dim 1 : vector<8x512xf32>, i32 -> vector<8x512xf32>
    %c64_52 = arith.constant 64 : index
    %c0_53 = arith.constant 0 : index
    %77 = vector.load %arg2[%c64_52, %c0_53] : memref<72x512xf32, #tpu.memory_space<vmem>>, vector<8x512xf32>
    %78 = arith.mulf %76, %77 : vector<8x512xf32>
    %79 = tpu.concatenate %55, %58 in 0 : vector<8x512xf32>, vector<8x512xf32> -> vector<16x512xf32>
    %80 = arith.truncf %79 : vector<16x512xf32> to vector<16x512xbf16>
    %c0_54 = arith.constant 0 : index
    %c0_55 = arith.constant 0 : index
    %81 = vector.load %arg8[%c0_54, %c0_55] : memref<80x512xbf16, #tpu.memory_space<vmem>>, vector<16x512xbf16>
    tpu.vector_store %arg8[%c0_54, %c0_55], %80 {strides = array<i32>} : memref<80x512xbf16, #tpu.memory_space<vmem>>, vector<16x512xbf16>,
    %82 = tpu.concatenate %61, %64 in 0 : vector<8x512xf32>, vector<8x512xf32> -> vector<16x512xf32>
    %83 = arith.truncf %82 : vector<16x512xf32> to vector<16x512xbf16>
    %c16_56 = arith.constant 16 : index
    %c0_57 = arith.constant 0 : index
    %84 = vector.load %arg8[%c16_56, %c0_57] : memref<80x512xbf16, #tpu.memory_space<vmem>>, vector<16x512xbf16>
    tpu.vector_store %arg8[%c16_56, %c0_57], %83 {strides = array<i32>} : memref<80x512xbf16, #tpu.memory_space<vmem>>, vector<16x512xbf16>,
    %85 = tpu.concatenate %66, %69 in 0 : vector<8x512xf32>, vector<8x512xf32> -> vector<16x512xf32>
    %86 = arith.truncf %85 : vector<16x512xf32> to vector<16x512xbf16>
    %c32_58 = arith.constant 32 : index
    %c0_59 = arith.constant 0 : index
    %87 = vector.load %arg8[%c32_58, %c0_59] : memref<80x512xbf16, #tpu.memory_space<vmem>>, vector<16x512xbf16>
    tpu.vector_store %arg8[%c32_58, %c0_59], %86 {strides = array<i32>} : memref<80x512xbf16, #tpu.memory_space<vmem>>, vector<16x512xbf16>,
    %88 = tpu.concatenate %72, %75 in 0 : vector<8x512xf32>, vector<8x512xf32> -> vector<16x512xf32>
    %89 = arith.truncf %88 : vector<16x512xf32> to vector<16x512xbf16>
    %c48_60 = arith.constant 48 : index
    %c0_61 = arith.constant 0 : index
    %90 = vector.load %arg8[%c48_60, %c0_61] : memref<80x512xbf16, #tpu.memory_space<vmem>>, vector<16x512xbf16>
    tpu.vector_store %arg8[%c48_60, %c0_61], %89 {strides = array<i32>} : memref<80x512xbf16, #tpu.memory_space<vmem>>, vector<16x512xbf16>,
    %91 = tpu.concatenate %78, %5 in 0 : vector<8x512xf32>, vector<8x512xf32> -> vector<16x512xf32>
    %92 = arith.truncf %91 : vector<16x512xf32> to vector<16x512xbf16>
    %c64_62 = arith.constant 64 : index
    %c0_63 = arith.constant 0 : index
    %93 = vector.load %arg8[%c64_62, %c0_63] : memref<80x512xbf16, #tpu.memory_space<vmem>>, vector<16x512xbf16>
    tpu.vector_store %arg8[%c64_62, %c0_63], %92 {strides = array<i32>} : memref<80x512xbf16, #tpu.memory_space<vmem>>, vector<16x512xbf16>,
    %c0_64 = arith.constant 0 : index
    %c0_65 = arith.constant 0 : index
    %94 = vector.load %arg4[%c0_64, %c0_65] : memref<8x80xbf16, #tpu.memory_space<vmem>>, vector<8x80xbf16>
    %c0_66 = arith.constant 0 : index
    %c0_67 = arith.constant 0 : index
    %95 = vector.load %arg8[%c0_66, %c0_67] : memref<80x512xbf16, #tpu.memory_space<vmem>>, vector<80x512xbf16>
    %cst_68 = arith.constant dense<0.000000e+00> : vector<8x512xf32>
    %96 = tpu.matmul %94, %95, %cst_68 {dimension_numbers = #tpu.dot_dimension_numbers<[1], [0], [0], [1], [0, 0, 1, 1], [], []>} : vector<8x80xbf16>, vector<80x512xbf16>, vector<8x512xf32> -> vector<8x512xf32>
    %c17_i32_69 = arith.constant 17 : i32
    %97 = tpu.dynamic_rotate %96 by %c17_i32_69 dim 1 : vector<8x512xf32>, i32 -> vector<8x512xf32>
    %c0_70 = arith.constant 0 : index
    %c0_71 = arith.constant 0 : index
    %98 = vector.load %arg2[%c0_70, %c0_71] : memref<72x512xf32, #tpu.memory_space<vmem>>, vector<8x512xf32>
    %99 = arith.mulf %97, %98 : vector<8x512xf32>
    %c16_i32_72 = arith.constant 16 : i32
    %100 = tpu.dynamic_rotate %96 by %c16_i32_72 dim 1 : vector<8x512xf32>, i32 -> vector<8x512xf32>
    %c8_73 = arith.constant 8 : index
    %c0_74 = arith.constant 0 : index
    %101 = vector.load %arg2[%c8_73, %c0_74] : memref<72x512xf32, #tpu.memory_space<vmem>>, vector<8x512xf32>
    %102 = arith.mulf %100, %101 : vector<8x512xf32>
    %c15_i32_75 = arith.constant 15 : i32
    %103 = tpu.dynamic_rotate %96 by %c15_i32_75 dim 1 : vector<8x512xf32>, i32 -> vector<8x512xf32>
    %c16_76 = arith.constant 16 : index
    %c0_77 = arith.constant 0 : index
    %104 = vector.load %arg2[%c16_76, %c0_77] : memref<72x512xf32, #tpu.memory_space<vmem>>, vector<8x512xf32>
    %105 = arith.mulf %103, %104 : vector<8x512xf32>
    %c1_i32_78 = arith.constant 1 : i32
    %106 = tpu.dynamic_rotate %96 by %c1_i32_78 dim 1 : vector<8x512xf32>, i32 -> vector<8x512xf32>
    %c24_79 = arith.constant 24 : index
    %c0_80 = arith.constant 0 : index
    %107 = vector.load %arg2[%c24_79, %c0_80] : memref<72x512xf32, #tpu.memory_space<vmem>>, vector<8x512xf32>
    %108 = arith.mulf %106, %107 : vector<8x512xf32>
    %c32_81 = arith.constant 32 : index
    %c0_82 = arith.constant 0 : index
    %109 = vector.load %arg2[%c32_81, %c0_82] : memref<72x512xf32, #tpu.memory_space<vmem>>, vector<8x512xf32>
    %110 = arith.mulf %96, %109 : vector<8x512xf32>
    %c511_i32_83 = arith.constant 511 : i32
    %111 = tpu.dynamic_rotate %96 by %c511_i32_83 dim 1 : vector<8x512xf32>, i32 -> vector<8x512xf32>
    %c40_84 = arith.constant 40 : index
    %c0_85 = arith.constant 0 : index
    %112 = vector.load %arg2[%c40_84, %c0_85] : memref<72x512xf32, #tpu.memory_space<vmem>>, vector<8x512xf32>
    %113 = arith.mulf %111, %112 : vector<8x512xf32>
    %c497_i32_86 = arith.constant 497 : i32
    %114 = tpu.dynamic_rotate %96 by %c497_i32_86 dim 1 : vector<8x512xf32>, i32 -> vector<8x512xf32>
    %c48_87 = arith.constant 48 : index
    %c0_88 = arith.constant 0 : index
    %115 = vector.load %arg2[%c48_87, %c0_88] : memref<72x512xf32, #tpu.memory_space<vmem>>, vector<8x512xf32>
    %116 = arith.mulf %114, %115 : vector<8x512xf32>
    %c496_i32_89 = arith.constant 496 : i32
    %117 = tpu.dynamic_rotate %96 by %c496_i32_89 dim 1 : vector<8x512xf32>, i32 -> vector<8x512xf32>
    %c56_90 = arith.constant 56 : index
    %c0_91 = arith.constant 0 : index
    %118 = vector.load %arg2[%c56_90, %c0_91] : memref<72x512xf32, #tpu.memory_space<vmem>>, vector<8x512xf32>
    %119 = arith.mulf %117, %118 : vector<8x512xf32>
    %c495_i32_92 = arith.constant 495 : i32
    %120 = tpu.dynamic_rotate %96 by %c495_i32_92 dim 1 : vector<8x512xf32>, i32 -> vector<8x512xf32>
    %c64_93 = arith.constant 64 : index
    %c0_94 = arith.constant 0 : index
    %121 = vector.load %arg2[%c64_93, %c0_94] : memref<72x512xf32, #tpu.memory_space<vmem>>, vector<8x512xf32>
    %122 = arith.mulf %120, %121 : vector<8x512xf32>
    %123 = tpu.concatenate %99, %102 in 0 : vector<8x512xf32>, vector<8x512xf32> -> vector<16x512xf32>
    %124 = arith.truncf %123 : vector<16x512xf32> to vector<16x512xbf16>
    %c0_95 = arith.constant 0 : index
    %c0_96 = arith.constant 0 : index
    %125 = vector.load %arg8[%c0_95, %c0_96] : memref<80x512xbf16, #tpu.memory_space<vmem>>, vector<16x512xbf16>
    tpu.vector_store %arg8[%c0_95, %c0_96], %124 {strides = array<i32>} : memref<80x512xbf16, #tpu.memory_space<vmem>>, vector<16x512xbf16>,
    %126 = tpu.concatenate %105, %108 in 0 : vector<8x512xf32>, vector<8x512xf32> -> vector<16x512xf32>
    %127 = arith.truncf %126 : vector<16x512xf32> to vector<16x512xbf16>
    %c16_97 = arith.constant 16 : index
    %c0_98 = arith.constant 0 : index
    %128 = vector.load %arg8[%c16_97, %c0_98] : memref<80x512xbf16, #tpu.memory_space<vmem>>, vector<16x512xbf16>
    tpu.vector_store %arg8[%c16_97, %c0_98], %127 {strides = array<i32>} : memref<80x512xbf16, #tpu.memory_space<vmem>>, vector<16x512xbf16>,
    %129 = tpu.concatenate %110, %113 in 0 : vector<8x512xf32>, vector<8x512xf32> -> vector<16x512xf32>
    %130 = arith.truncf %129 : vector<16x512xf32> to vector<16x512xbf16>
    %c32_99 = arith.constant 32 : index
    %c0_100 = arith.constant 0 : index
    %131 = vector.load %arg8[%c32_99, %c0_100] : memref<80x512xbf16, #tpu.memory_space<vmem>>, vector<16x512xbf16>
    tpu.vector_store %arg8[%c32_99, %c0_100], %130 {strides = array<i32>} : memref<80x512xbf16, #tpu.memory_space<vmem>>, vector<16x512xbf16>,
    %132 = tpu.concatenate %116, %119 in 0 : vector<8x512xf32>, vector<8x512xf32> -> vector<16x512xf32>
    %133 = arith.truncf %132 : vector<16x512xf32> to vector<16x512xbf16>
    %c48_101 = arith.constant 48 : index
    %c0_102 = arith.constant 0 : index
    %134 = vector.load %arg8[%c48_101, %c0_102] : memref<80x512xbf16, #tpu.memory_space<vmem>>, vector<16x512xbf16>
    tpu.vector_store %arg8[%c48_101, %c0_102], %133 {strides = array<i32>} : memref<80x512xbf16, #tpu.memory_space<vmem>>, vector<16x512xbf16>,
    %135 = tpu.concatenate %122, %5 in 0 : vector<8x512xf32>, vector<8x512xf32> -> vector<16x512xf32>
    %136 = arith.truncf %135 : vector<16x512xf32> to vector<16x512xbf16>
    %c64_103 = arith.constant 64 : index
    %c0_104 = arith.constant 0 : index
    %137 = vector.load %arg8[%c64_103, %c0_104] : memref<80x512xbf16, #tpu.memory_space<vmem>>, vector<16x512xbf16>
    tpu.vector_store %arg8[%c64_103, %c0_104], %136 {strides = array<i32>} : memref<80x512xbf16, #tpu.memory_space<vmem>>, vector<16x512xbf16>,
    %c0_105 = arith.constant 0 : index
    %c0_106 = arith.constant 0 : index
    %138 = vector.load %arg5[%c0_105, %c0_106] : memref<8x80xbf16, #tpu.memory_space<vmem>>, vector<8x80xbf16>
    %c0_107 = arith.constant 0 : index
    %c0_108 = arith.constant 0 : index
    %139 = vector.load %arg8[%c0_107, %c0_108] : memref<80x512xbf16, #tpu.memory_space<vmem>>, vector<80x512xbf16>
    %cst_109 = arith.constant dense<0.000000e+00> : vector<8x512xf32>
    %140 = tpu.matmul %138, %139, %cst_109 {dimension_numbers = #tpu.dot_dimension_numbers<[1], [0], [0], [1], [0, 0, 1, 1], [], []>} : vector<8x80xbf16>, vector<80x512xbf16>, vector<8x512xf32> -> vector<8x512xf32>
    %cst_110 = arith.constant 0.000000e+00 : f32
    %141 = vector.broadcast %cst_110 : f32 to vector<8x512xf32>
    %142 = arith.maximumf %140, %141 : vector<8x512xf32>
    %c17_i32_111 = arith.constant 17 : i32
    %143 = tpu.dynamic_rotate %142 by %c17_i32_111 dim 1 : vector<8x512xf32>, i32 -> vector<8x512xf32>
    %c0_112 = arith.constant 0 : index
    %c0_113 = arith.constant 0 : index
    %144 = vector.load %arg2[%c0_112, %c0_113] : memref<72x512xf32, #tpu.memory_space<vmem>>, vector<8x512xf32>
    %145 = arith.mulf %143, %144 : vector<8x512xf32>
    %c16_i32_114 = arith.constant 16 : i32
    %146 = tpu.dynamic_rotate %142 by %c16_i32_114 dim 1 : vector<8x512xf32>, i32 -> vector<8x512xf32>
    %c8_115 = arith.constant 8 : index
    %c0_116 = arith.constant 0 : index
    %147 = vector.load %arg2[%c8_115, %c0_116] : memref<72x512xf32, #tpu.memory_space<vmem>>, vector<8x512xf32>
    %148 = arith.mulf %146, %147 : vector<8x512xf32>
    %c15_i32_117 = arith.constant 15 : i32
    %149 = tpu.dynamic_rotate %142 by %c15_i32_117 dim 1 : vector<8x512xf32>, i32 -> vector<8x512xf32>
    %c16_118 = arith.constant 16 : index
    %c0_119 = arith.constant 0 : index
    %150 = vector.load %arg2[%c16_118, %c0_119] : memref<72x512xf32, #tpu.memory_space<vmem>>, vector<8x512xf32>
    %151 = arith.mulf %149, %150 : vector<8x512xf32>
    %c1_i32_120 = arith.constant 1 : i32
    %152 = tpu.dynamic_rotate %142 by %c1_i32_120 dim 1 : vector<8x512xf32>, i32 -> vector<8x512xf32>
    %c24_121 = arith.constant 24 : index
    %c0_122 = arith.constant 0 : index
    %153 = vector.load %arg2[%c24_121, %c0_122] : memref<72x512xf32, #tpu.memory_space<vmem>>, vector<8x512xf32>
    %154 = arith.mulf %152, %153 : vector<8x512xf32>
    %c32_123 = arith.constant 32 : index
    %c0_124 = arith.constant 0 : index
    %155 = vector.load %arg2[%c32_123, %c0_124] : memref<72x512xf32, #tpu.memory_space<vmem>>, vector<8x512xf32>
    %156 = arith.mulf %142, %155 : vector<8x512xf32>
    %c511_i32_125 = arith.constant 511 : i32
    %157 = tpu.dynamic_rotate %142 by %c511_i32_125 dim 1 : vector<8x512xf32>, i32 -> vector<8x512xf32>
    %c40_126 = arith.constant 40 : index
    %c0_127 = arith.constant 0 : index
    %158 = vector.load %arg2[%c40_126, %c0_127] : memref<72x512xf32, #tpu.memory_space<vmem>>, vector<8x512xf32>
    %159 = arith.mulf %157, %158 : vector<8x512xf32>
    %c497_i32_128 = arith.constant 497 : i32
    %160 = tpu.dynamic_rotate %142 by %c497_i32_128 dim 1 : vector<8x512xf32>, i32 -> vector<8x512xf32>
    %c48_129 = arith.constant 48 : index
    %c0_130 = arith.constant 0 : index
    %161 = vector.load %arg2[%c48_129, %c0_130] : memref<72x512xf32, #tpu.memory_space<vmem>>, vector<8x512xf32>
    %162 = arith.mulf %160, %161 : vector<8x512xf32>
    %c496_i32_131 = arith.constant 496 : i32
    %163 = tpu.dynamic_rotate %142 by %c496_i32_131 dim 1 : vector<8x512xf32>, i32 -> vector<8x512xf32>
    %c56_132 = arith.constant 56 : index
    %c0_133 = arith.constant 0 : index
    %164 = vector.load %arg2[%c56_132, %c0_133] : memref<72x512xf32, #tpu.memory_space<vmem>>, vector<8x512xf32>
    %165 = arith.mulf %163, %164 : vector<8x512xf32>
    %c495_i32_134 = arith.constant 495 : i32
    %166 = tpu.dynamic_rotate %142 by %c495_i32_134 dim 1 : vector<8x512xf32>, i32 -> vector<8x512xf32>
    %c64_135 = arith.constant 64 : index
    %c0_136 = arith.constant 0 : index
    %167 = vector.load %arg2[%c64_135, %c0_136] : memref<72x512xf32, #tpu.memory_space<vmem>>, vector<8x512xf32>
    %168 = arith.mulf %166, %167 : vector<8x512xf32>
    %169 = tpu.concatenate %145, %148 in 0 : vector<8x512xf32>, vector<8x512xf32> -> vector<16x512xf32>
    %170 = arith.truncf %169 : vector<16x512xf32> to vector<16x512xbf16>
    %c0_137 = arith.constant 0 : index
    %c0_138 = arith.constant 0 : index
    %171 = vector.load %arg8[%c0_137, %c0_138] : memref<80x512xbf16, #tpu.memory_space<vmem>>, vector<16x512xbf16>
    tpu.vector_store %arg8[%c0_137, %c0_138], %170 {strides = array<i32>} : memref<80x512xbf16, #tpu.memory_space<vmem>>, vector<16x512xbf16>,
    %172 = tpu.concatenate %151, %154 in 0 : vector<8x512xf32>, vector<8x512xf32> -> vector<16x512xf32>
    %173 = arith.truncf %172 : vector<16x512xf32> to vector<16x512xbf16>
    %c16_139 = arith.constant 16 : index
    %c0_140 = arith.constant 0 : index
    %174 = vector.load %arg8[%c16_139, %c0_140] : memref<80x512xbf16, #tpu.memory_space<vmem>>, vector<16x512xbf16>
    tpu.vector_store %arg8[%c16_139, %c0_140], %173 {strides = array<i32>} : memref<80x512xbf16, #tpu.memory_space<vmem>>, vector<16x512xbf16>,
    %175 = tpu.concatenate %156, %159 in 0 : vector<8x512xf32>, vector<8x512xf32> -> vector<16x512xf32>
    %176 = arith.truncf %175 : vector<16x512xf32> to vector<16x512xbf16>
    %c32_141 = arith.constant 32 : index
    %c0_142 = arith.constant 0 : index
    %177 = vector.load %arg8[%c32_141, %c0_142] : memref<80x512xbf16, #tpu.memory_space<vmem>>, vector<16x512xbf16>
    tpu.vector_store %arg8[%c32_141, %c0_142], %176 {strides = array<i32>} : memref<80x512xbf16, #tpu.memory_space<vmem>>, vector<16x512xbf16>,
    %178 = tpu.concatenate %162, %165 in 0 : vector<8x512xf32>, vector<8x512xf32> -> vector<16x512xf32>
    %179 = arith.truncf %178 : vector<16x512xf32> to vector<16x512xbf16>
    %c48_143 = arith.constant 48 : index
    %c0_144 = arith.constant 0 : index
    %180 = vector.load %arg8[%c48_143, %c0_144] : memref<80x512xbf16, #tpu.memory_space<vmem>>, vector<16x512xbf16>
    tpu.vector_store %arg8[%c48_143, %c0_144], %179 {strides = array<i32>} : memref<80x512xbf16, #tpu.memory_space<vmem>>, vector<16x512xbf16>,
    %181 = tpu.concatenate %168, %5 in 0 : vector<8x512xf32>, vector<8x512xf32> -> vector<16x512xf32>
    %182 = arith.truncf %181 : vector<16x512xf32> to vector<16x512xbf16>
    %c64_145 = arith.constant 64 : index
    %c0_146 = arith.constant 0 : index
    %183 = vector.load %arg8[%c64_145, %c0_146] : memref<80x512xbf16, #tpu.memory_space<vmem>>, vector<16x512xbf16>
    tpu.vector_store %arg8[%c64_145, %c0_146], %182 {strides = array<i32>} : memref<80x512xbf16, #tpu.memory_space<vmem>>, vector<16x512xbf16>,
    %c0_147 = arith.constant 0 : index
    %c0_148 = arith.constant 0 : index
    %184 = vector.load %arg6[%c0_147, %c0_148] : memref<8x80xbf16, #tpu.memory_space<vmem>>, vector<8x80xbf16>
    %c0_149 = arith.constant 0 : index
    %c0_150 = arith.constant 0 : index
    %185 = vector.load %arg8[%c0_149, %c0_150] : memref<80x512xbf16, #tpu.memory_space<vmem>>, vector<80x512xbf16>
    %cst_151 = arith.constant dense<0.000000e+00> : vector<8x512xf32>
    %186 = tpu.matmul %184, %185, %cst_151 {dimension_numbers = #tpu.dot_dimension_numbers<[1], [0], [0], [1], [0, 0, 1, 1], [], []>} : vector<8x80xbf16>, vector<80x512xbf16>, vector<8x512xf32> -> vector<8x512xf32>
    %cst_152 = arith.constant 5.000000e-02 : f32
    %187 = vector.broadcast %cst_152 : f32 to vector<8x512xf32>
    %188 = arith.mulf %186, %187 : vector<8x512xf32>
    %189 = arith.addf %188, %96 : vector<8x512xf32>
    %cst_153 = arith.constant 0.952380955 : f32
    %190 = vector.broadcast %cst_153 : f32 to vector<8x512xf32>
    %191 = arith.mulf %189, %190 : vector<8x512xf32>
    %c0_154 = arith.constant 0 : index
    %c0_155 = arith.constant 0 : index
    %192 = vector.load %arg7[%c0_154, %c0_155] : memref<8x512xf32, #tpu.memory_space<vmem>>, vector<8x512xf32>
    tpu.vector_store %arg7[%c0_154, %c0_155], %191 {strides = array<i32>} : memref<8x512xf32, #tpu.memory_space<vmem>>, vector<8x512xf32>,
    return
  }
  func.func @transform_0(%arg0: i32) -> (i32, i32) {
    %c0_i32 = arith.constant 0 : i32
    %c0_i32_0 = arith.constant 0 : i32
    %c0_i32_1 = arith.constant 0 : i32
    return %c0_i32, %c0_i32_0 : i32, i32
  }
  func.func @transform_1(%arg0: i32) -> (i32, i32) {
    %c0_i32 = arith.constant 0 : i32
    %c0_i32_0 = arith.constant 0 : i32
    %c0_i32_1 = arith.constant 0 : i32
    return %c0_i32, %c0_i32_0 : i32, i32
  }
  func.func @transform_2(%arg0: i32) -> (i32, i32) {
    %c0_i32 = arith.constant 0 : i32
    %c0_i32_0 = arith.constant 0 : i32
    %c0_i32_1 = arith.constant 0 : i32
    return %c0_i32, %c0_i32_0 : i32, i32
  }
  func.func @transform_3(%arg0: i32) -> (i32, i32) {
    %c0_i32 = arith.constant 0 : i32
    %c0_i32_0 = arith.constant 0 : i32
    %c0_i32_1 = arith.constant 0 : i32
    return %c0_i32, %c0_i32_0 : i32, i32
  }
  func.func @transform_4(%arg0: i32) -> (i32, i32) {
    %c0_i32 = arith.constant 0 : i32
    %c0_i32_0 = arith.constant 0 : i32
    %c0_i32_1 = arith.constant 0 : i32
    return %c0_i32, %c0_i32_0 : i32, i32
  }
  func.func @transform_5(%arg0: i32) -> (i32, i32) {
    %c0_i32 = arith.constant 0 : i32
    %c0_i32_0 = arith.constant 0 : i32
    %c0_i32_1 = arith.constant 0 : i32
    return %c0_i32, %c0_i32_0 : i32, i32
  }
  func.func @transform_6(%arg0: i32) -> (i32, i32) {
    %c0_i32 = arith.constant 0 : i32
    %c0_i32_0 = arith.constant 0 : i32
    %c0_i32_1 = arith.constant 0 : i32
    return %c0_i32, %c0_i32_0 : i32, i32
  }
}

</mosaic_0001>

<bundles_post_ra>
// kernel: final_net_forward.1
= control target key start
LH: loop header
LB: loop body
LE: loop exit
PB: predicated region body
PF: predicated region fallthrough
CT: control target
= control target key end

     0   :  { %s2027_s27 = smov 111   ;;  %s2028_s28 = smov 113   ;;  %v24_v5 = vlaneseq  ;;  %v2035_v7 = vmov 0.0   ;;  %vm370_vm9 = vcmask 654336   ;;  %s3291_s0 = inlined_call_operand.vmem [shape: f32[8,512], index: 0, kind: input, shape index: {}]   ;;  %s3292_s1 = inlined_call_operand.vmem [shape: f32[72,512], index: 1, kind: input, shape index: {}]   ;;  %s3293_s2 = inlined_call_operand.vmem [shape: bf16[8,80], index: 2, kind: input, shape index: {}]   ;;  %s3294_s3 = inlined_call_operand.vmem [shape: bf16[8,80], index: 3, kind: input, shape index: {}]   ;;  %s3295_s4 = inlined_call_operand.vmem [shape: bf16[8,80], index: 4, kind: input, shape index: {}]   ;;  %s3296_s5 = inlined_call_operand.vmem [shape: bf16[8,80], index: 5, kind: input, shape index: {}]   ;;  %s3297_s6 = inlined_call_operand.vmem [shape: f32[8,512], index: 6, kind: output, shape index: {}]  }
   0x1   :  { %v2074_v0 = vld [vmem:[%s3291_s0 + $0x18] sm:$0xff]  ;;  %v2079_v1 = vld [vmem:[%s3291_s0 + $0x10] sm:$0xff]  ;;  %v2084_v2 = vld [vmem:[%s3291_s0] sm:$0xff]  ;;  %s2029_s29 = smov 112   ;;  %s2030_s8 = smov 127  }
   0x2   :  { %195 = vrot.lane.b32.xlu1 %v2074_v0, %s2027_s27  ;;  %151 = vrot.lane.b32.xlu2 %v2079_v1, %s2028_s28  ;;  %v2107_v3 = vld [vmem:[%s3291_s0 + $0x8] sm:$0xff]  ;;  %s2031_s0 = smov 15   ;;  %s2032_s9 = smov 1   ;;  %v25_v6 = vshrl.u32 %v24_v5, 7  ;;  %v2168_v16 = vand.u32 127, %v24_v5  ;;  %v2175_v18 = vld [vmem:[%s3292_s1 + $0x90] sm:$0xff] }
   0x3   :  { %189 = vrot.lane.b32.xlu0 %v2084_v2, %s2027_s27  ;;  %s2033_s10 = smov 17   ;;  %s2034_s11 = smov 16   ;;  %v2181_v19 = vld [vmem:[%s3292_s1 + $0x98] sm:$0xff]  ;;  %v124_v20 = vmul.f32 %v2175_v18, %v2079_v1  ;;  %v2191_v22 = vld [vmem:[%s3292_s1 + $0xd0] sm:$0xff]  ;;  %v2234_v42 = vld [vmem:[%s3292_s1 + $0xe8] sm:$0xff] }
   0x4   :  { %vm26_vm0 = vcmp.eq.s32.totalorder %v25_v6, 0  ;;  %vm155_vm1 = vcmp.lt.s32.totalorder %v2168_v16, 113  ;;  %vm197_vm2 = vcmp.lt.s32.totalorder %v2168_v16, 111  ;;  %v125_v21 = vmul.f32 %v2181_v19, %v2074_v0  ;;  %v2199_v24 = vld [vmem:[%s3292_s1 + $0xd8] sm:$0xff]  ;;  %v2218_v32 = vld [vmem:[%s3292_s1 + $0x110] sm:$0xff]  ;;  %v2246_v46 = vld [vmem:[%s3292_s1 + $0xe0] sm:$0xff] }
   0x5   :  { %v27_v8 = vsel %vm26_vm0, 1.0, %v2035_v7  ;;  %v2208_v28 = vld [vmem:[%s3292_s1 + $0x118] sm:$0xff]  ;;  %vm176_vm3 = vcmp.lt.s32.totalorder %v2168_v16, 112  ;;  %v2239_v43 = vld [vmem:[%s3292_s1 + $0xf0] sm:$0xff]  ;;  %v2279_v5 = vld [vmem:[%s3292_s1 + $0x108] sm:$0xff]  ;;  %vm134_vm4 = vcmp.lt.s32.totalorder %v2168_v16, 127 }
   0x6   :  { %v2157_v9 = vpack.c.bf16 %v27_v8, %v27_v8  ;;  %v227_v27 = vpack.c.bf16 %v125_v21, %v124_v20  ;;  %v2251_v47 = vld [vmem:[%s3292_s1 + $0xf8] sm:$0xff]  ;;  %v2305_v21 = vld [vmem:[%s3292_s1 + $0xc0] sm:$0xff]  ;;  %vm84_vm5 = vcmp.lt.s32.totalorder %v2168_v16, 15  ;;  %vm105_vm6 = vcmp.lt.s32.totalorder %v2168_v16, 1 }
   0x7   :  { %vm42_vm7 = vcmp.lt.s32.totalorder %v2168_v16, 17  ;;  %vm63_vm8 = vcmp.lt.s32.totalorder %v2168_v16, 16 }
   0x8   :  { %3306 = vst [vmem:[#allocation3_spill] sm:$0xff] %v2157_v9 }
   0x9   :  { %248 = vst [vmem:[#allocation2 + $0x98] sm:$0xff] %v2157_v9 }
   0xa   :  { %153 = vrot.lane.b32.xlu2 %v2074_v0, %s2028_s28  ;;  %147 = vrot.lane.b32.xlu1 %v2084_v2, %s2028_s28  ;;  %247 = vst [vmem:[#allocation2 + $0x90] sm:$0xff] %v2157_v9 }
   0xb   :  { %193 = vrot.lane.b32.xlu0 %v2079_v1, %s2027_s27  ;;  %231 = vst [vmem:[#allocation2 + $0x48] sm:$0xff] %v227_v27 }
  0x10   :  { %v2161_v11 = vld [vmem:[#allocation2 + $0x94] sm:$0xf0]  ;;  %v2163_v12 = vld [vmem:[#allocation2 + $0x98] sm:$0xf0] }
  0x11   :  { %635 = vst [vmem:[#allocation2 + $0x98] sm:$0xff] %v2157_v9  ;;  %v2201_v25 = vld [vmem:[#allocation2 + $0x8c] sm:$0xf0]  ;;  %v2203_v26 = vld [vmem:[#allocation2 + $0x90] sm:$0xf0] }
  0x12   :  { %174 = vrot.lane.b32.xlu2 %v2074_v0, %s2029_s29  ;;  %172 = vrot.lane.b32.xlu1 %v2079_v1, %s2029_s29  ;;  %634 = vst [vmem:[#allocation2 + $0x90] sm:$0xff] %v2157_v9 }
  0x13   :  { %168 = vrot.lane.b32.xlu0 %v2084_v2, %s2029_s29 }
  0x1a   :  { %130 = vrot.lane.b32.xlu2 %v2079_v1, %s2030_s8  ;;  %126 = vrot.lane.b32.xlu1 %v2084_v2, %s2030_s8 }
  0x1b   :  { %191 = vrot.lane.b32.xlu0 %v2107_v3, %s2027_s27 }
  0x22   :  { %170 = vrot.lane.b32.xlu2 %v2107_v3, %s2029_s29  ;;  %149 = vrot.lane.b32.xlu1 %v2107_v3, %s2028_s28 }
  0x23   :  { %132 = vrot.lane.b32.xlu0 %v2074_v0, %s2030_s8 }
  0x2a   :  { %82 = vrot.lane.b32.xlu2 %v2074_v0, %s2031_s0  ;;  %80 = vrot.lane.b32.xlu1 %v2079_v1, %s2031_s0 }
  0x2b   :  { %78 = vrot.lane.b32.xlu0 %v2107_v3, %s2031_s0 }
  0x32   :  { %103 = vrot.lane.b32.xlu2 %v2074_v0, %s2032_s9  ;;  %101 = vrot.lane.b32.xlu1 %v2079_v1, %s2032_s9 }
  0x33   :  { %99 = vrot.lane.b32.xlu0 %v2107_v3, %s2032_s9 }
  0x3a   :  { %36 = vrot.lane.b32.xlu2 %v2079_v1, %s2033_s10  ;;  %34 = vrot.lane.b32.xlu1 %v2107_v3, %s2033_s10 }
  0x3b   :  { %128 = vrot.lane.b32.xlu0 %v2107_v3, %s2030_s8 }
  0x42   :  { %59 = vrot.lane.b32.xlu2 %v2079_v1, %s2034_s11  ;;  %57 = vrot.lane.b32.xlu1 %v2107_v3, %s2034_s11  ;;  %v2274_v1 = vld [vmem:[%s3292_s1 + $0x100] sm:$0xff] }
  0x43   :  { %38 = vrot.lane.b32.xlu0 %v2074_v0, %s2033_s10 }
  0x4a   :  { %97 = vrot.lane.b32.xlu2 %v2084_v2, %s2032_s9  ;;  %76 = vrot.lane.b32.xlu1 %v2084_v2, %s2031_s0 }
  0x4b   :  { %61 = vrot.lane.b32.xlu0 %v2074_v0, %s2034_s11 }
  0x52   :  { %55 = vrot.lane.b32.xlu1 %v2084_v2, %s2034_s11 }
  0x53   :  { %32 = vrot.lane.b32.xlu0 %v2084_v2, %s2033_s10 }
  0x5c   :  { %v2155_v4 = vpop.permute.xlu2 %151 }
  0x64   :  { %v154_v10 = vpop.permute.xlu2 %153 }
  0x65   :  { %v156_v23 = vsel %vm155_vm1, %v2155_v4, %v154_v10 }
  0x66   :  { %v166_v35 = vmul.f32 %v2191_v22, %v156_v23  ;;  %v2310_v23 = vld [vmem:[%s3292_s1 + $0xc8] sm:$0xff] }
  0x6c   :  { %v175_v13 = vpop.permute.xlu2 %174 }
  0x74   :  { %v196_v14 = vpop.permute.xlu1 %195  ;;  %v2166_v15 = vpop.permute.xlu2 %130 }
  0x75   :  { %v2170_v17 = vpop.permute.xlu0 %189 }
  0x76   :  { %v201_v29 = vsel %vm197_vm2, %v196_v14, %v2170_v17 }
  0x77   :  { %v209_v38 = vmul.f32 %v2208_v28, %v201_v29 }
  0x7c   :  { %v171_v30 = vpop.permute.xlu2 %170  ;;  %v2213_v31 = vpop.permute.xlu1 %147 }
  0x7d   :  { %v159_v33 = vsel %vm155_vm1, %v154_v10, %v2213_v31  ;;  %v194_v34 = vpop.permute.xlu0 %193 }
  0x7e   :  { %v167_v36 = vmul.f32 %v2199_v24, %v159_v33  ;;  %v198_v37 = vsel %vm197_vm2, %v194_v34, %v196_v14 }
  0x7f   :  { %v208_v39 = vmul.f32 %v2218_v32, %v198_v37  ;;  %v2318_v37 = vld [vmem:[%s3292_s1 + $0xb0] sm:$0xff] }
  0x80   :  { %v235_v40 = vpack.c.bf16 %v167_v36, %v166_v35 }
  0x81   :  { %v243_v41 = vpack.c.bf16 %v209_v38, %v208_v39 }
  0x82   :  { %239 = vst [vmem:[#allocation2 + $0x68] sm:$0xff] %v235_v40  ;;  %v2329_v40 = vld [vmem:[%s3292_s1 + $0xb8] sm:$0xff] }
  0x83   :  { %246 = vst [vmem:[#allocation2 + $0x88] sm:$0xff] %v243_v41 }
  0x84   :  { %v2241_v44 = vpop.permute.xlu2 %82  ;;  %v173_v45 = vpop.permute.xlu1 %172 }
  0x85   :  { %v177_v48 = vsel %vm176_vm3, %v173_v45, %v175_v13  ;;  %v178_v49 = vsel %vm176_vm3, %v171_v30, %v173_v45  ;;  %v169_v50 = vpop.permute.xlu0 %168 }
  0x86   :  { %v186_v51 = vmul.f32 %v2234_v42, %v178_v49  ;;  %v187_v52 = vmul.f32 %v2239_v43, %v177_v48  ;;  %v179_v53 = vsel %vm176_vm3, %v169_v50, %v171_v30  ;;  %v180_v54 = vsel %vm176_vm3, %v175_v13, %v169_v50  ;;  %v2296_v13 = vld [vmem:[%s3292_s1 + $0x88] sm:$0xff] }
  0x87   :  { %v185_v55 = vmul.f32 %v2246_v46, %v179_v53  ;;  %v188_v56 = vmul.f32 %v2251_v47, %v180_v54  ;;  %3308 = vst [vmem:[#allocation5_spill] sm:$0xff] %v2296_v13 }
  0x89   :  { %v236_v57 = vpack.c.bf16 %v186_v51, %v185_v55  ;;  %v237_v58 = vpack.c.bf16 %v188_v56, %v187_v52  ;;  %v1658_v27 = vld [vmem:[#allocation2 + $0x68] sm:$0xf]  ;;  %v1949_v29 = vld [vmem:[#allocation2 + $0x6c] sm:$0xf]  ;;  %v2345_v55 = vld [vmem:[%s3292_s1 + $0x58] sm:$0xff] }
  0x8a   :  { %v1674_v59 = vld [vmem:[#allocation2 + $0x88] sm:$0xf]  ;;  %v1953_v60 = vld [vmem:[#allocation2 + $0x8c] sm:$0xf] }
  0x8b   :  { %240 = vst [vmem:[#allocation2 + $0x70] sm:$0xff] %v236_v57  ;;  %v1675_v61 = vor.u32 %v2161_v11, %v1674_v59  ;;  %v1679_v62 = vor.u32 %v1953_v60, %v2163_v12  ;;  %v2291_v12 = vld [vmem:[%s3292_s1 + $0x80] sm:$0xff]  ;;  %v2354_v60 = vld [vmem:[%s3292_s1 + $0x50] sm:$0xff] }
  0x8c   :  { %241 = vst [vmem:[#allocation2 + $0x78] sm:$0xff] %v237_v58  ;;  %v2267_v63 = vpop.permute.xlu2 %103  ;;  %v2269_v0 = vpop.permute.xlu1 %126  ;;  %v122_v14 = vmul.f32 %v2291_v12, %v2084_v2 }
  0x8d   :  { %403 = vmatpush.bf16.msra.mxu2 %v1675_v61  ;;  %416 = vmatpush.bf16.msra.mxu3 %v1679_v62  ;;  %v192_v6 = vpop.permute.xlu0 %191  ;;  %3307 = vst [vmem:[#allocation4_spill] sm:$0xff] %v2291_v12 }
  0x8e   :  { %v199_v7 = vsel %vm197_vm2, %v192_v6, %v194_v34  ;;  %v200_v8 = vsel %vm197_vm2, %v2170_v17, %v192_v6  ;;  %v123_v17 = vmul.f32 %v2296_v13, %v2107_v3 }
  0x8f   :  { %v206_v10 = vmul.f32 %v2274_v1, %v200_v8  ;;  %v207_v11 = vmul.f32 %v2279_v5, %v199_v7  ;;  %v1642_v8 = vld [vmem:[#allocation2 + $0x48] sm:$0xf] }
  0x90   :  { %v226_v30 = vpack.c.bf16 %v123_v17, %v122_v14 }
  0x91   :  { %v242_v20 = vpack.c.bf16 %v207_v11, %v206_v10  ;;  %v1945_v10 = vld [vmem:[#allocation2 + $0x4c] sm:$0xf] }
  0x92   :  { %230 = vst [vmem:[#allocation2 + $0x40] sm:$0xff] %v226_v30  ;;  %v1950_v7 = vld [vmem:[#allocation2 + $0x6c] sm:$0xf0] }
  0x93   :  { %245 = vst [vmem:[#allocation2 + $0x80] sm:$0xff] %v242_v20  ;;  %v1951_v33 = vld [vmem:[#allocation2 + $0x74] sm:$0xf0]  ;;  %v1660_v2 = vld [vmem:[#allocation2 + $0x78] sm:$0xf0] }
  0x94   :  { %v2313_v3 = vpop.permute.xlu2 %36  ;;  %v150_v34 = vpop.permute.xlu1 %149  ;;  %v1659_v35 = vor.u32 %v1951_v33, %v1658_v27  ;;  %v1663_v36 = vor.u32 %v1949_v29, %v1660_v2  ;;  %v1652_v20 = vld [vmem:[#allocation2 + $0x70] sm:$0xf0]  ;;  %v2370_v27 = vld [vmem:[%s3292_s1 + $0x60] sm:$0xff]  ;;  %v2375_v33 = vld [vmem:[%s3292_s1 + $0x78] sm:$0xff] }
  0x95   :  { %v157_v38 = vsel %vm155_vm1, %v150_v34, %v2155_v4  ;;  %v158_v39 = vsel %vm155_vm1, %v2213_v31, %v150_v34  ;;  %v133_v41 = vpop.permute.xlu0 %132 }
  0x96   :  { %v164_v45 = vmul.f32 %v2305_v21, %v158_v39  ;;  %v165_v48 = vmul.f32 %v2310_v23, %v157_v38  ;;  %404 = vmatpush.bf16.msra.mxu2 %v1659_v35  ;;  %417 = vmatpush.bf16.msra.mxu3 %v1663_v36  ;;  %v135_v4 = vsel %vm134_vm4, %v2166_v15, %v133_v41 }
  0x97   :  { %v138_v31 = vsel %vm134_vm4, %v133_v41, %v2269_v0  ;;  %v145_v49 = vmul.f32 %v2318_v37, %v135_v4  ;;  %v2380_v41 = vld [vmem:[%s3292_s1 + $0x70] sm:$0xff]  ;;  %v2391_v4 = vld [vmem:[%s3292_s1 + $0x68] sm:$0xff] }
  0x98   :  { %v234_v50 = vpack.c.bf16 %v165_v48, %v164_v45  ;;  %v146_v51 = vmul.f32 %v2329_v40, %v138_v31 }
  0x9a   :  { %238 = vst [vmem:[#allocation2 + $0x60] sm:$0xff] %v234_v50  ;;  %v229_v52 = vpack.c.bf16 %v146_v51, %v145_v49  ;;  %v1666_v53 = vld [vmem:[#allocation2 + $0x80] sm:$0xf]  ;;  %v1952_v54 = vld [vmem:[#allocation2 + $0x84] sm:$0xf] }
  0x9b   :  { %v1667_v56 = vor.u32 %v2201_v25, %v1666_v53  ;;  %v1671_v57 = vor.u32 %v1952_v54, %v2203_v26 }
  0x9c   :  { %233 = vst [vmem:[#allocation2 + $0x58] sm:$0xff] %v229_v52  ;;  %v2349_v58 = vpop.permute.xlu2 %59  ;;  %v81_v59 = vpop.permute.xlu1 %80 }
  0x9d   :  { %v85_v61 = vsel %vm84_vm5, %v81_v59, %v2241_v44  ;;  %377 = vmatpush.bf16.msra.mxu0 %v1667_v56  ;;  %390 = vmatpush.bf16.msra.mxu1 %v1671_v57  ;;  %v2359_v62 = vpop.permute.xlu0 %78 }
  0x9e   :  { %v96_v25 = vmul.f32 %v2345_v55, %v85_v61  ;;  %v86_v26 = vsel %vm84_vm5, %v2359_v62, %v81_v59  ;;  %v2406_v59 = vld [vmem:[%s3292_s1 + $0xa0] sm:$0xff]  ;;  %v2411_v61 = vld [vmem:[%s3292_s1 + $0xa8] sm:$0xff] }
  0x9f   :  { %v95_v6 = vmul.f32 %v2354_v60, %v86_v26 }
  0xa1   :  { %v219_v11 = vpack.c.bf16 %v96_v25, %v95_v6  ;;  %v1650_v14 = vld [vmem:[#allocation2 + $0x60] sm:$0xf]  ;;  %v1948_v17 = vld [vmem:[#allocation2 + $0x64] sm:$0xf] }
  0xa2   :  { %v1651_v29 = vor.u32 %v1950_v7, %v1650_v14  ;;  %v1655_v30 = vor.u32 %v1948_v17, %v1652_v20 }
  0xa3   :  { %223 = vst [vmem:[#allocation2 + $0x28] sm:$0xff] %v219_v11  ;;  %v1947_v2 = vld [vmem:[#allocation2 + $0x54] sm:$0xf0]  ;;  %v1644_v34 = vld [vmem:[#allocation2 + $0x58] sm:$0xf0] }
  0xa4   :  { %v98_v35 = vpop.permute.xlu2 %97  ;;  %v102_v36 = vpop.permute.xlu1 %101  ;;  %378 = vmatpush.bf16.msra.mxu0 %v1651_v29  ;;  %391 = vmatpush.bf16.msra.mxu1 %v1655_v30  ;;  %v1643_v38 = vor.u32 %v1947_v2, %v1642_v8  ;;  %v1647_v39 = vor.u32 %v1945_v10, %v1644_v34  ;;  %v2434_v34 = vld [vmem:[%s3292_s1 + $0x18] sm:$0xff] }
  0xa5   :  { %v109_v45 = vsel %vm105_vm6, %v2267_v63, %v98_v35  ;;  %v106_v48 = vsel %vm105_vm6, %v102_v36, %v2267_v63  ;;  %v100_v31 = vpop.permute.xlu0 %99 }
  0xa6   :  { %v114_v49 = vmul.f32 %v2370_v27, %v109_v45  ;;  %v117_v50 = vmul.f32 %v2375_v33, %v106_v48  ;;  %405 = vmatpush.bf16.msra.mxu2 %v1643_v38  ;;  %418 = vmatpush.bf16.msra.mxu3 %v1647_v39  ;;  %v107_v51 = vsel %vm105_vm6, %v100_v31, %v102_v36  ;;  %v1634_v45 = vld [vmem:[#allocation2 + $0x40] sm:$0xf]  ;;  %v1944_v48 = vld [vmem:[#allocation2 + $0x44] sm:$0xf] }
  0xa7   :  { %v108_v52 = vsel %vm105_vm6, %v98_v35, %v100_v31  ;;  %v116_v63 = vmul.f32 %v2380_v41, %v107_v51  ;;  %v2445_v51 = vld [vmem:[%s3292_s1 + $0x40] sm:$0xff] }
  0xa8   :  { %v115_v53 = vmul.f32 %v2391_v4, %v108_v52 }
  0xa9   :  { %v221_v54 = vpack.c.bf16 %v117_v50, %v116_v63 }
  0xaa   :  { %v220_v56 = vpack.c.bf16 %v115_v53, %v114_v49  ;;  %v1626_v11 = vld [vmem:[#allocation2 + $0x28] sm:$0xf]  ;;  %v1941_v17 = vld [vmem:[#allocation2 + $0x2c] sm:$0xf]  ;;  %v2455_v53 = vld [vmem:[%s3292_s1 + $0x30] sm:$0xff] }
  0xab   :  { %225 = vst [vmem:[#allocation2 + $0x38] sm:$0xff] %v221_v54 }
  0xac   :  { %224 = vst [vmem:[#allocation2 + $0x30] sm:$0xff] %v220_v56  ;;  %v2401_v57 = vpop.permute.xlu1 %34 }
  0xad   :  { %v129_v25 = vpop.permute.xlu0 %128 }
  0xae   :  { %v136_v26 = vsel %vm134_vm4, %v129_v25, %v2166_v15  ;;  %v137_v6 = vsel %vm134_vm4, %v2269_v0, %v129_v25  ;;  %v2425_v15 = vld [vmem:[%s3292_s1 + $0x10] sm:$0xff]  ;;  %v44_v0 = vsel %vm42_vm7, %v2401_v57, %v2313_v3  ;;  %v2463_v25 = vld [vmem:[%s3292_s1 + $0x38] sm:$0xff] }
  0xaf   :  { %v143_v7 = vmul.f32 %v2406_v59, %v137_v6  ;;  %v144_v8 = vmul.f32 %v2411_v61, %v136_v26  ;;  %v53_v38 = vmul.f32 %v2425_v15, %v44_v0  ;;  %v2496_v0 = vld [vmem:[%s3292_s1 + $0x8] sm:$0xff] }
  0xb1   :  { %v228_v10 = vpack.c.bf16 %v144_v8, %v143_v7 }
  0xb2   :  { %v1943_v14 = vld [vmem:[#allocation2 + $0x34] sm:$0xf0]  ;;  %v1628_v20 = vld [vmem:[#allocation2 + $0x38] sm:$0xf0] }
  0xb3   :  { %232 = vst [vmem:[#allocation2 + $0x50] sm:$0xff] %v228_v10  ;;  %v1627_v29 = vor.u32 %v1943_v14, %v1626_v11  ;;  %v1631_v30 = vor.u32 %v1941_v17, %v1628_v20 }
  0xb4   :  { %v58_v2 = vpop.permute.xlu1 %57 }
  0xb5   :  { %406 = vmatpush.bf16.msra.mxu2 %v1627_v29  ;;  %419 = vmatpush.bf16.msra.mxu3 %v1631_v30  ;;  %v39_v35 = vpop.permute.xlu0 %38  ;;  %v65_v54 = vsel %vm63_vm8, %v58_v2, %v2349_v58  ;;  %v2486_v29 = vld [vmem:[%s3292_s1 + $0x28] sm:$0xff] }
  0xb6   :  { %v43_v36 = vsel %vm42_vm7, %v2313_v3, %v39_v35  ;;  %v2450_v3 = vld [vmem:[%s3292_s1 + $0x48] sm:$0xff]  ;;  %v74_v14 = vmul.f32 %v2455_v53, %v65_v54  ;;  %3310 = vst [vmem:[#allocation7_spill] sm:$0xff] %v2486_v29  ;;  %v1620_v54 = vld [vmem:[#allocation2 + $0x30] sm:$0xf0] }
  0xb7   :  { %v54_v39 = vmul.f32 %v2434_v34, %v43_v36 }
  0xb9   :  { %v211_v31 = vpack.c.bf16 %v54_v39, %v53_v38 }
  0xba   :  { %v1946_v49 = vld [vmem:[#allocation2 + $0x4c] sm:$0xf0]  ;;  %v1636_v50 = vld [vmem:[#allocation2 + $0x50] sm:$0xf0] }
  0xbb   :  { %215 = vst [vmem:[#allocation2 + $0x8] sm:$0xff] %v211_v31  ;;  %v1635_v52 = vor.u32 %v1946_v49, %v1634_v45  ;;  %v1639_v63 = vor.u32 %v1944_v48, %v1636_v50 }
  0xbc   :  { %v77_v56 = vpop.permute.xlu1 %76 }
  0xbd   :  { %v87_v26 = vsel %vm84_vm5, %v77_v56, %v2359_v62  ;;  %v88_v6 = vsel %vm84_vm5, %v2241_v44, %v77_v56  ;;  %v62_v7 = vpop.permute.xlu0 %61  ;;  %379 = vmatpush.bf16.msra.mxu0 %v1635_v52  ;;  %392 = vmatpush.bf16.msra.mxu1 %v1639_v63  ;;  %v2481_v44 = vld [vmem:[%s3292_s1 + $0x20] sm:$0xff]  ;;  %v1942_v63 = vld [vmem:[#allocation2 + $0x2c] sm:$0xf0] }
  0xbe   :  { %v93_v8 = vmul.f32 %v2445_v51, %v88_v6  ;;  %v94_v10 = vmul.f32 %v2450_v3, %v87_v26  ;;  %v64_v11 = vsel %vm63_vm8, %v2349_v58, %v62_v7  ;;  %3309 = vst [vmem:[#allocation6_spill] sm:$0xff] %v2481_v44  ;;  %v2491_v58 = vld [vmem:[%s3292_s1] sm:$0xff] }
  0xbf   :  { %v75_v17 = vmul.f32 %v2463_v25, %v64_v11 }
  0xc0   :  { %v218_v62 = vpack.c.bf16 %v94_v10, %v93_v8 }
  0xc1   :  { %v213_v20 = vpack.c.bf16 %v75_v17, %v74_v14 }
  0xc2   :  { %222 = vst [vmem:[#allocation2 + $0x20] sm:$0xff] %v218_v62  ;;  %v1610_v56 = vld [vmem:[#allocation2 + $0x8] sm:$0xf]  ;;  %v1937_v8 = vld [vmem:[#allocation2 + $0xc] sm:$0xf] }
  0xc3   :  { %217 = vst [vmem:[#allocation2 + $0x18] sm:$0xff] %v213_v20  ;;  %v249_v62 = vld [vmem:[%s3293_s2] sm:$0xf] }
  0xc4   :  { %v56_v30 = vpop.permute.xlu1 %55 }
  0xc5   :  { %v66_v36 = vsel %vm63_vm8, %v56_v30, %v58_v2  ;;  %v67_v38 = vsel %vm63_vm8, %v62_v7, %v56_v30  ;;  %v33_v39 = vpop.permute.xlu0 %32 }
  0xc6   :  { %v72_v45 = vmul.f32 %v2481_v44, %v67_v38  ;;  %v73_v48 = vmul.f32 %v2486_v29, %v66_v36  ;;  %v45_v31 = vsel %vm42_vm7, %v33_v39, %v2401_v57  ;;  %v46_v49 = vsel %vm42_vm7, %v39_v35, %v33_v39 }
  0xc7   :  { %v51_v50 = vmul.f32 %v2491_v58, %v46_v49  ;;  %v52_v52 = vmul.f32 %v2496_v0, %v45_v31 }
  0xc8   :  { %v212_v2 = vpack.c.bf16 %v73_v48, %v72_v45 }
  0xc9   :  { %v210_v26 = vpack.c.bf16 %v52_v52, %v51_v50  ;;  %v1618_v6 = vld [vmem:[#allocation2 + $0x20] sm:$0xf]  ;;  %v1940_v7 = vld [vmem:[#allocation2 + $0x24] sm:$0xf] }
  0xca   :  { %216 = vst [vmem:[#allocation2 + $0x10] sm:$0xff] %v212_v2  ;;  %v1619_v10 = vor.u32 %v1942_v63, %v1618_v6  ;;  %v1623_v11 = vor.u32 %v1940_v7, %v1620_v54  ;;  %v1939_v14 = vld [vmem:[#allocation2 + $0x14] sm:$0xf0]  ;;  %v1612_v57 = vld [vmem:[#allocation2 + $0x18] sm:$0xf0] }
  0xcb   :  { %214 = vst [vmem:[#allocation2] sm:$0xff] %v210_v26  ;;  %v1611_v17 = vor.u32 %v1939_v14, %v1610_v56  ;;  %v1615_v35 = vor.u32 %v1937_v8, %v1612_v57 }
  0xcc   :  { %380 = vmatpush.bf16.msra.mxu0 %v1619_v10  ;;  %393 = vmatpush.bf16.msra.mxu1 %v1623_v11 }
  0xcd   :  { %407 = vmatpush.bf16.msra.mxu2 %v1611_v17  ;;  %420 = vmatpush.bf16.msra.mxu3 %v1615_v35 }
  0xd0   :  { %1683 = vmatmul.msk.bf16.vlgmr.msra.gmra.mxu3 %vm370_vm9, %v249_v62  ;;  %1682 = vmatmul.msk.bf16.vlgmr.msra.gmra.mxu2 %vm370_vm9, %v249_v62 }
  0xd1   :  { %v1938_v20 = vld [vmem:[#allocation2 + $0xc] sm:$0xf0]  ;;  %v1604_v30 = vld [vmem:[#allocation2 + $0x10] sm:$0xf0] }
  0xd2   :  { %v1602_v36 = vld [vmem:[#allocation2] sm:$0xf]  ;;  %v1936_v38 = vld [vmem:[#allocation2 + $0x4] sm:$0xf] }
  0xd3   :  { %v1603_v39 = vor.u32 %v1938_v20, %v1602_v36  ;;  %v1607_v45 = vor.u32 %v1936_v38, %v1604_v30 }
  0xd5   :  { %381 = vmatpush.bf16.msra.mxu0 %v1603_v39  ;;  %394 = vmatpush.bf16.msra.mxu1 %v1607_v45 }
  0xd8   :  { %1680 = vmatmul.msk.bf16.vlgmr.msra.gmra.mxu0 %vm370_vm9, %v249_v62  ;;  %1681 = vmatmul.msk.bf16.vlgmr.msra.gmra.mxu1 %vm370_vm9, %v249_v62 }
 0x153   :  { %v422_v48 = vpop.f32.mrf.mxu3  ;;  %v409_v31 = vpop.f32.mrf.mxu2 }
 0x154   :  { %v429_v49 = vmax.f32 %v422_v48, 0.0  ;;  %v428_v50 = vmax.f32 %v409_v31, 0.0  ;;  %v2564_v31 = vld [vmem:[#allocation2 + $0x94] sm:$0xf0] }
 0x155   :  { %v383_v52 = vpop.f32.mrf.mxu0  ;;  %v396_v2 = vpop.f32.mrf.mxu1 }
 0x156   :  { %v426_v63 = vmax.f32 %v383_v52, 0.0  ;;  %v427_v54 = vmax.f32 %v396_v2, 0.0  ;;  %v517_v56 = vmul.f32 %v429_v49, %v2181_v19  ;;  %v516_v26 = vmul.f32 %v428_v50, %v2175_v18  ;;  %v1974_v52 = vld [vmem:[#allocation2 + $0x8c] sm:$0xf0]  ;;  %v1752_v2 = vld [vmem:[#allocation2 + $0x90] sm:$0xf0] }
 0x157   :  { %1016 = vst [vmem:[#allocation2 + $0x90] sm:$0xff] %v2157_v9 }
 0x158   :  { %v514_v6 = vmul.f32 %v426_v63, %v2291_v12  ;;  %v515_v7 = vmul.f32 %v427_v54, %v2296_v13  ;;  %518 = vrot.lane.b32.xlu0 %v426_v63, %s2030_s8  ;;  %578 = vrot.lane.b32.xlu2 %v426_v63, %s2027_s27  ;;  %v615_v8 = vpack.c.bf16 %v517_v56, %v516_v26 }
 0x159   :  { %560 = vrot.lane.b32.xlu1 %v427_v54, %s2029_s29 }
 0x15a   :  { %v614_v10 = vpack.c.bf16 %v515_v7, %v514_v6  ;;  %619 = vst [vmem:[#allocation2 + $0x48] sm:$0xff] %v615_v8 }
 0x15b   :  { %v424_v11 = vpop.f32.mrf.mxu3  ;;  %v411_v14 = vpop.f32.mrf.mxu2 }
 0x15c   :  { %618 = vst [vmem:[#allocation2 + $0x40] sm:$0xff] %v614_v10 }
 0x15d   :  { %v385_v57 = vpop.f32.mrf.mxu0  ;;  %v398_v19 = vpop.f32.mrf.mxu1 }
 0x160   :  { %538 = vrot.lane.b32.xlu2 %v426_v63, %s2028_s28  ;;  %540 = vrot.lane.b32.xlu0 %v427_v54, %s2028_s28 }
 0x161   :  { %584 = vrot.lane.b32.xlu1 %v429_v49, %s2027_s27 }
 0x168   :  { %558 = vrot.lane.b32.xlu2 %v426_v63, %s2029_s29  ;;  %432 = vrot.lane.b32.xlu0 %v427_v54, %s2033_s10 }
 0x169   :  { %544 = vrot.lane.b32.xlu1 %v429_v49, %s2028_s28 }
 0x170   :  { %452 = vrot.lane.b32.xlu0 %v427_v54, %s2034_s11  ;;  %580 = vrot.lane.b32.xlu2 %v427_v54, %s2027_s27 }
 0x171   :  { %564 = vrot.lane.b32.xlu1 %v429_v49, %s2029_s29 }
 0x178   :  { %582 = vrot.lane.b32.xlu0 %v428_v50, %s2027_s27  ;;  %472 = vrot.lane.b32.xlu2 %v427_v54, %s2031_s0 }
 0x179   :  { %522 = vrot.lane.b32.xlu1 %v428_v50, %s2030_s8 }
 0x180   :  { %542 = vrot.lane.b32.xlu0 %v428_v50, %s2028_s28  ;;  %492 = vrot.lane.b32.xlu2 %v427_v54, %s2032_s9 }
 0x181   :  { %476 = vrot.lane.b32.xlu1 %v429_v49, %s2031_s0 }
 0x188   :  { %562 = vrot.lane.b32.xlu0 %v428_v50, %s2029_s29  ;;  %520 = vrot.lane.b32.xlu2 %v427_v54, %s2030_s8 }
 0x189   :  { %496 = vrot.lane.b32.xlu1 %v429_v49, %s2032_s9 }
 0x190   :  { %474 = vrot.lane.b32.xlu0 %v428_v50, %s2031_s0  ;;  %524 = vrot.lane.b32.xlu2 %v429_v49, %s2030_s8 }
 0x191   :  { %434 = vrot.lane.b32.xlu1 %v428_v50, %s2033_s10 }
 0x198   :  { %494 = vrot.lane.b32.xlu0 %v428_v50, %s2032_s9  ;;  %436 = vrot.lane.b32.xlu2 %v429_v49, %s2033_s10 }
 0x199   :  { %454 = vrot.lane.b32.xlu1 %v428_v50, %s2034_s11 }
 0x1a0   :  { %470 = vrot.lane.b32.xlu0 %v426_v63, %s2031_s0  ;;  %456 = vrot.lane.b32.xlu2 %v429_v49, %s2034_s11  ;;  %v2566_v49 = vld [vmem:[#allocation2 + $0x98] sm:$0xf0] }
 0x1a1   :  { %490 = vrot.lane.b32.xlu1 %v426_v63, %s2032_s9  ;;  %1017 = vst [vmem:[#allocation2 + $0x98] sm:$0xff] %v2157_v9 }
 0x1a8   :  { %450 = vrot.lane.b32.xlu0 %v426_v63, %s2034_s11  ;;  %430 = vrot.lane.b32.xlu2 %v426_v63, %s2033_s10 }
 0x1b2   :  { %v579_v18 = vpop.permute.xlu2 %578 }
 0x1ba   :  { %v539_v17 = vpop.permute.xlu2 %538 }
 0x1c2   :  { %v2554_v35 = vpop.permute.xlu2 %558 }
 0x1ca   :  { %v519_v62 = vpop.permute.xlu0 %518  ;;  %v581_v20 = vpop.permute.xlu2 %580 }
 0x1cb   :  { %v2556_v30 = vpop.permute.xlu1 %560  ;;  %v588_v26 = vsel %vm197_vm2, %v579_v18, %v581_v20 }
 0x1cc   :  { %v594_v7 = vmul.f32 %v588_v26, %v2274_v1 }
 0x1d2   :  { %v541_v36 = vpop.permute.xlu0 %540  ;;  %v2558_v38 = vpop.permute.xlu2 %472 }
 0x1d3   :  { %v585_v39 = vpop.permute.xlu1 %584 }
 0x1d4   :  { %v589_v6 = vsel %vm197_vm2, %v585_v39, %v579_v18 }
 0x1d5   :  { %v597_v14 = vmul.f32 %v589_v6, %v2208_v28 }
 0x1da   :  { %v2560_v45 = vpop.permute.xlu0 %432  ;;  %v2562_v48 = vpop.permute.xlu2 %492 }
 0x1db   :  { %v545_v50 = vpop.permute.xlu1 %544 }
 0x1e2   :  { %v2570_v63 = vpop.permute.xlu0 %452  ;;  %v521_v54 = vpop.permute.xlu2 %520 }
 0x1e3   :  { %v565_v56 = vpop.permute.xlu1 %564  ;;  %v528_v8 = vsel %vm134_vm4, %v519_v62, %v521_v54 }
 0x1e4   :  { %v534_v6 = vmul.f32 %v528_v8, %v2406_v59 }
 0x1ea   :  { %v583_v10 = vpop.permute.xlu0 %582  ;;  %v525_v11 = vpop.permute.xlu2 %524 }
 0x1eb   :  { %v523_v57 = vpop.permute.xlu1 %522  ;;  %v586_v19 = vsel %vm197_vm2, %v583_v10, %v585_v39  ;;  %v587_v9 = vsel %vm197_vm2, %v581_v20, %v583_v10  ;;  %v529_v13 = vsel %vm134_vm4, %v525_v11, %v519_v62 }
 0x1ec   :  { %v527_v1 = vsel %vm134_vm4, %v521_v54, %v523_v57  ;;  %v595_v18 = vmul.f32 %v587_v9, %v2279_v5  ;;  %v596_v26 = vmul.f32 %v586_v19, %v2218_v32  ;;  %v526_v28 = vsel %vm134_vm4, %v523_v57, %v525_v11 }
 0x1ed   :  { %v535_v39 = vmul.f32 %v527_v1, %v2411_v61  ;;  %v536_v12 = vmul.f32 %v526_v28, %v2318_v37  ;;  %v537_v20 = vmul.f32 %v529_v13, %v2329_v40  ;;  %v548_v9 = vsel %vm155_vm1, %v539_v17, %v541_v36 }
 0x1ee   :  { %v630_v10 = vpack.c.bf16 %v595_v18, %v594_v7  ;;  %v631_v62 = vpack.c.bf16 %v597_v14, %v596_v26  ;;  %v549_v32 = vsel %vm155_vm1, %v545_v50, %v539_v17  ;;  %v554_v37 = vmul.f32 %v548_v9, %v2305_v21 }
 0x1ef   :  { %v616_v29 = vpack.c.bf16 %v535_v39, %v534_v6  ;;  %v617_v44 = vpack.c.bf16 %v537_v20, %v536_v12  ;;  %v557_v40 = vmul.f32 %v549_v32, %v2199_v24  ;;  %v569_v24 = vsel %vm176_vm3, %v565_v56, %v2554_v35 }
 0x1f0   :  { %632 = vst [vmem:[#allocation2 + $0x80] sm:$0xff] %v630_v10 }
 0x1f1   :  { %620 = vst [vmem:[#allocation2 + $0x50] sm:$0xff] %v616_v29 }
 0x1f2   :  { %633 = vst [vmem:[#allocation2 + $0x88] sm:$0xff] %v631_v62  ;;  %v543_v5 = vpop.permute.xlu0 %542  ;;  %v437_v59 = vpop.permute.xlu2 %436 }
 0x1f3   :  { %621 = vst [vmem:[#allocation2 + $0x58] sm:$0xff] %v617_v44  ;;  %v2600_v61 = vpop.permute.xlu1 %476  ;;  %v546_v13 = vsel %vm155_vm1, %v543_v5, %v545_v50  ;;  %v547_v12 = vsel %vm155_vm1, %v541_v36, %v543_v5  ;;  %v568_v50 = vsel %vm176_vm3, %v2554_v35, %v2556_v30 }
 0x1f4   :  { %v555_v54 = vmul.f32 %v547_v12, %v2310_v23  ;;  %v556_v29 = vmul.f32 %v546_v13, %v2191_v22  ;;  %v574_v1 = vmul.f32 %v568_v50, %v2246_v46 }
 0x1f6   :  { %v622_v17 = vpack.c.bf16 %v555_v54, %v554_v37  ;;  %v623_v7 = vpack.c.bf16 %v557_v40, %v556_v29 }
 0x1f7   :  { %v1750_v8 = vld [vmem:[#allocation2 + $0x80] sm:$0xf]  ;;  %v1972_v44 = vld [vmem:[#allocation2 + $0x84] sm:$0xf] }
 0x1f8   :  { %626 = vst [vmem:[#allocation2 + $0x60] sm:$0xff] %v622_v17  ;;  %v1751_v11 = vor.u32 %v1974_v52, %v1750_v8  ;;  %v1755_v36 = vor.u32 %v1972_v44, %v1752_v2  ;;  %v1966_v12 = vld [vmem:[#allocation2 + $0x4c] sm:$0xf0]  ;;  %v1720_v29 = vld [vmem:[#allocation2 + $0x50] sm:$0xf0] }
 0x1f9   :  { %627 = vst [vmem:[#allocation2 + $0x68] sm:$0xff] %v623_v7  ;;  %v1758_v21 = vld [vmem:[#allocation2 + $0x88] sm:$0xf]  ;;  %v1973_v23 = vld [vmem:[#allocation2 + $0x8c] sm:$0xf] }
 0x1fa   :  { %v1759_v22 = vor.u32 %v2564_v31, %v1758_v21  ;;  %v1763_v14 = vor.u32 %v1973_v23, %v2566_v49  ;;  %v563_v57 = vpop.permute.xlu0 %562  ;;  %763 = vmatpush.bf16.msrb.mxu0 %v1751_v11  ;;  %776 = vmatpush.bf16.msrb.mxu1 %v1755_v36  ;;  %v2619_v19 = vpop.permute.xlu2 %456  ;;  %v577_v31 = vmul.f32 %v569_v24, %v2251_v47  ;;  %v1964_v11 = vld [vmem:[#allocation2 + $0x44] sm:$0xf]  ;;  %v1967_v21 = vld [vmem:[#allocation2 + $0x54] sm:$0xf0]  ;;  %v1728_v23 = vld [vmem:[#allocation2 + $0x58] sm:$0xf0] }
 0x1fb   :  { %v2622_v52 = vpop.permute.xlu1 %496  ;;  %v566_v2 = vsel %vm176_vm3, %v563_v57, %v565_v56  ;;  %v567_v35 = vsel %vm176_vm3, %v2556_v30, %v563_v57 }
 0x1fc   :  { %789 = vmatpush.bf16.msrb.mxu2 %v1759_v22  ;;  %802 = vmatpush.bf16.msrb.mxu3 %v1763_v14  ;;  %v575_v49 = vmul.f32 %v567_v35, %v2234_v42  ;;  %v576_v18 = vmul.f32 %v566_v2, %v2239_v43 }
 0x1fe   :  { %v624_v26 = vpack.c.bf16 %v575_v49, %v574_v1  ;;  %v625_v28 = vpack.c.bf16 %v577_v31, %v576_v18  ;;  %v1723_v1 = vor.u32 %v1964_v11, %v1720_v29  ;;  %v1726_v18 = vld [vmem:[#allocation2 + $0x48] sm:$0xf]  ;;  %v3312_v29 = vld [vmem:[#allocation7_spill] sm:$0xff] }
 0x1ff   :  { %v1968_v54 = vld [vmem:[#allocation2 + $0x64] sm:$0xf] }
 0x200   :  { %628 = vst [vmem:[#allocation2 + $0x70] sm:$0xff] %v624_v26  ;;  %v1742_v40 = vld [vmem:[#allocation2 + $0x68] sm:$0xf]  ;;  %v1969_v7 = vld [vmem:[#allocation2 + $0x6c] sm:$0xf] }
 0x201   :  { %629 = vst [vmem:[#allocation2 + $0x78] sm:$0xff] %v625_v28  ;;  %v1965_v26 = vld [vmem:[#allocation2 + $0x4c] sm:$0xf] }
 0x202   :  { %v475_v46 = vpop.permute.xlu0 %474  ;;  %v431_v6 = vpop.permute.xlu2 %430 }
 0x203   :  { %v435_v39 = vpop.permute.xlu1 %434  ;;  %v478_v56 = vsel %vm84_vm5, %v475_v46, %v2600_v61  ;;  %v479_v47 = vsel %vm84_vm5, %v2558_v38, %v475_v46  ;;  %v440_v42 = vsel %vm42_vm7, %v431_v6, %v2560_v45  ;;  %v441_v43 = vsel %vm42_vm7, %v437_v59, %v431_v6 }
 0x204   :  { %v438_v30 = vsel %vm42_vm7, %v435_v39, %v437_v59  ;;  %v439_v20 = vsel %vm42_vm7, %v2560_v45, %v435_v39  ;;  %v488_v10 = vmul.f32 %v479_v47, %v2354_v60  ;;  %v489_v62 = vmul.f32 %v478_v56, %v2345_v55  ;;  %v1734_v59 = vld [vmem:[#allocation2 + $0x60] sm:$0xf] }
 0x205   :  { %v448_v9 = vmul.f32 %v439_v20, %v2425_v15  ;;  %v449_v32 = vmul.f32 %v438_v30, %v2434_v34  ;;  %v446_v5 = vmul.f32 %v441_v43, %v2491_v58  ;;  %v447_v13 = vmul.f32 %v440_v42, %v2496_v0  ;;  %v1718_v0 = vld [vmem:[#allocation2 + $0x40] sm:$0xf] }
 0x206   :  { %v607_v37 = vpack.c.bf16 %v489_v62, %v488_v10  ;;  %v1719_v24 = vor.u32 %v1966_v12, %v1718_v0  ;;  %v1727_v6 = vor.u32 %v1967_v21, %v1726_v18  ;;  %v1731_v39 = vor.u32 %v1965_v26, %v1728_v23  ;;  %v3316_v26 = vld [vmem:[#allocation5_spill] sm:$0xff] }
 0x207   :  { %v599_v17 = vpack.c.bf16 %v449_v32, %v448_v9  ;;  %v598_v45 = vpack.c.bf16 %v447_v13, %v446_v5  ;;  %v1970_v60 = vld [vmem:[#allocation2 + $0x6c] sm:$0xf0]  ;;  %v1736_v8 = vld [vmem:[#allocation2 + $0x70] sm:$0xf0] }
 0x208   :  { %611 = vst [vmem:[#allocation2 + $0x28] sm:$0xff] %v607_v37  ;;  %v1971_v55 = vld [vmem:[#allocation2 + $0x74] sm:$0xf0]  ;;  %v1744_v15 = vld [vmem:[#allocation2 + $0x78] sm:$0xf0]  ;;  %v1735_v44 = vor.u32 %v1970_v60, %v1734_v59  ;;  %v1739_v34 = vor.u32 %v1968_v54, %v1736_v8 }
 0x209   :  { %603 = vst [vmem:[#allocation2 + $0x8] sm:$0xff] %v599_v17  ;;  %v1743_v58 = vor.u32 %v1971_v55, %v1742_v40  ;;  %v1747_v50 = vor.u32 %v1969_v7, %v1744_v15  ;;  %v3311_v59 = vld [vmem:[#allocation6_spill] sm:$0xff]  ;;  %v636_v8 = vld [vmem:[%s3294_s3] sm:$0xf] }
 0x20a   :  { %602 = vst [vmem:[#allocation2] sm:$0xff] %v598_v45  ;;  %v495_v36 = vpop.permute.xlu0 %494  ;;  %764 = vmatpush.bf16.msrb.mxu0 %v1735_v44  ;;  %777 = vmatpush.bf16.msrb.mxu1 %v1739_v34 }
 0x20b   :  { %v455_v22 = vpop.permute.xlu1 %454  ;;  %790 = vmatpush.bf16.msrb.mxu2 %v1743_v58  ;;  %803 = vmatpush.bf16.msrb.mxu3 %v1747_v50  ;;  %v498_v14 = vsel %vm105_vm6, %v495_v36, %v2622_v52  ;;  %v499_v57 = vsel %vm105_vm6, %v2562_v48, %v495_v36 }
 0x20c   :  { %v458_v2 = vsel %vm63_vm8, %v455_v22, %v2619_v19  ;;  %v459_v35 = vsel %vm63_vm8, %v2570_v63, %v455_v22  ;;  %v508_v31 = vmul.f32 %v499_v57, %v2380_v41  ;;  %v509_v49 = vmul.f32 %v498_v14, %v2375_v33  ;;  %v2025_v22 = vld [vmem:[%s3292_s1 + $0x98] sm:$0xff]  ;;  %v2026_v57 = vld [vmem:[%s3292_s1 + $0x90] sm:$0xff] }
 0x20d   :  { %v468_v28 = vmul.f32 %v459_v35, %v2455_v53  ;;  %v469_v46 = vmul.f32 %v458_v2, %v2463_v25 }
 0x20e   :  { %v609_v56 = vpack.c.bf16 %v509_v49, %v508_v31  ;;  %765 = vmatpush.bf16.msrb.mxu0 %v1719_v24  ;;  %778 = vmatpush.bf16.msrb.mxu1 %v1723_v1  ;;  %v3315_v49 = vld [vmem:[#allocation4_spill] sm:$0xff] }
 0x20f   :  { %v601_v47 = vpack.c.bf16 %v469_v46, %v468_v28  ;;  %791 = vmatpush.bf16.msrb.mxu2 %v1727_v6  ;;  %804 = vmatpush.bf16.msrb.mxu3 %v1731_v39  ;;  %v1710_v9 = vld [vmem:[#allocation2 + $0x28] sm:$0xf]  ;;  %v1961_v5 = vld [vmem:[#allocation2 + $0x2c] sm:$0xf] }
 0x210   :  { %613 = vst [vmem:[#allocation2 + $0x38] sm:$0xff] %v609_v56 }
 0x211   :  { %605 = vst [vmem:[#allocation2 + $0x18] sm:$0xff] %v601_v47  ;;  %v1686_v58 = vld [vmem:[#allocation2] sm:$0xf]  ;;  %v1956_v0 = vld [vmem:[#allocation2 + $0x4] sm:$0xf] }
 0x212   :  { %v471_v42 = vpop.permute.xlu0 %470 }
 0x213   :  { %v491_v41 = vpop.permute.xlu1 %490  ;;  %v480_v33 = vsel %vm84_vm5, %v471_v42, %v2558_v38  ;;  %v481_v53 = vsel %vm84_vm5, %v2600_v61, %v471_v42 }
 0x214   :  { %v500_v25 = vsel %vm105_vm6, %v491_v41, %v2562_v48  ;;  %v501_v43 = vsel %vm105_vm6, %v2622_v52, %v491_v41  ;;  %v486_v30 = vmul.f32 %v481_v53, %v2445_v51  ;;  %v487_v20 = vmul.f32 %v480_v33, %v2450_v3  ;;  %v1694_v51 = vld [vmem:[#allocation2 + $0x8] sm:$0xf]  ;;  %v1957_v3 = vld [vmem:[#allocation2 + $0xc] sm:$0xf]  ;;  %v1995_v53 = vld [vmem:[#allocation2 + $0x94] sm:$0xf0] }
 0x215   :  { %v506_v10 = vmul.f32 %v501_v43, %v2370_v27  ;;  %v507_v38 = vmul.f32 %v500_v25, %v2391_v4  ;;  %v1844_v25 = vld [vmem:[#allocation2 + $0x98] sm:$0xf0]  ;;  %v3317_v43 = vld [vmem:[#allocation3_spill] sm:$0xff] }
 0x216   :  { %v606_v62 = vpack.c.bf16 %v487_v20, %v486_v30  ;;  %1403 = vst [vmem:[#allocation2 + $0x98] sm:$0xff] %v3317_v43 }
 0x217   :  { %v608_v32 = vpack.c.bf16 %v507_v38, %v506_v10  ;;  %v1963_v61 = vld [vmem:[#allocation2 + $0x34] sm:$0xf0]  ;;  %v1712_v13 = vld [vmem:[#allocation2 + $0x38] sm:$0xf0] }
 0x218   :  { %610 = vst [vmem:[#allocation2 + $0x20] sm:$0xff] %v606_v62  ;;  %v1711_v48 = vor.u32 %v1963_v61, %v1710_v9  ;;  %v1715_v12 = vor.u32 %v1961_v5, %v1712_v13  ;;  %v1959_v37 = vld [vmem:[#allocation2 + $0x14] sm:$0xf0]  ;;  %v1696_v52 = vld [vmem:[#allocation2 + $0x18] sm:$0xf0]  ;;  %v2800_v9 = vld [vmem:[%s3292_s1 + $0x110] sm:$0xff] }
 0x219   :  { %612 = vst [vmem:[#allocation2 + $0x30] sm:$0xff] %v608_v32  ;;  %v1695_v45 = vor.u32 %v1959_v37, %v1694_v51  ;;  %v1699_v7 = vor.u32 %v1957_v3, %v1696_v52  ;;  %v2795_v38 = vld [vmem:[%s3292_s1 + $0x118] sm:$0xff]  ;;  %v2802_v61 = vld [vmem:[#allocation2 + $0x8c] sm:$0xf0]  ;;  %v2804_v5 = vld [vmem:[#allocation2 + $0x90] sm:$0xf0] }
 0x21a   :  { %v451_v40 = vpop.permute.xlu0 %450  ;;  %792 = vmatpush.bf16.msrb.mxu2 %v1711_v48  ;;  %805 = vmatpush.bf16.msrb.mxu3 %v1715_v12  ;;  %1402 = vst [vmem:[#allocation2 + $0x90] sm:$0xff] %v3317_v43  ;;  %v2823_v51 = vld [vmem:[%s3292_s1 + $0xc8] sm:$0xff] }
 0x21b   :  { %v460_v27 = vsel %vm63_vm8, %v451_v40, %v2570_v63  ;;  %v461_v4 = vsel %vm63_vm8, %v2619_v19, %v451_v40 }
 0x21c   :  { %v466_v54 = vmul.f32 %v461_v4, %v3311_v59  ;;  %v467_v17 = vmul.f32 %v460_v27, %v3312_v29  ;;  %v2816_v27 = vld [vmem:[%s3292_s1 + $0xc0] sm:$0xff]  ;;  %v2828_v59 = vld [vmem:[%s3292_s1 + $0xd8] sm:$0xff] }
 0x21e   :  { %v600_v60 = vpack.c.bf16 %v467_v17, %v466_v54  ;;  %793 = vmatpush.bf16.msrb.mxu2 %v1695_v45  ;;  %806 = vmatpush.bf16.msrb.mxu3 %v1699_v7  ;;  %v2833_v54 = vld [vmem:[%s3292_s1 + $0xd0] sm:$0xff] }
 0x21f   :  { %v1702_v63 = vld [vmem:[#allocation2 + $0x20] sm:$0xf]  ;;  %v1960_v55 = vld [vmem:[#allocation2 + $0x24] sm:$0xf] }
 0x220   :  { %604 = vst [vmem:[#allocation2 + $0x10] sm:$0xff] %v600_v60  ;;  %v1962_v15 = vld [vmem:[#allocation2 + $0x2c] sm:$0xf0]  ;;  %v1704_v19 = vld [vmem:[#allocation2 + $0x30] sm:$0xf0] }
 0x221   :  { %v1703_v44 = vor.u32 %v1962_v15, %v1702_v63  ;;  %v1707_v34 = vor.u32 %v1960_v55, %v1704_v19  ;;  %1767 = vmatmul.msk.bf16.vlgmr.msrb.gmra.mxu3 %vm370_vm9, %v636_v8  ;;  %1766 = vmatmul.msk.bf16.vlgmr.msrb.gmra.mxu2 %vm370_vm9, %v636_v8 }
 0x223   :  { %766 = vmatpush.bf16.msrb.mxu0 %v1703_v44  ;;  %779 = vmatpush.bf16.msrb.mxu1 %v1707_v34  ;;  %v2848_v44 = vld [vmem:[%s3292_s1 + $0xe0] sm:$0xff] }
 0x227   :  { %v1958_v50 = vld [vmem:[#allocation2 + $0xc] sm:$0xf0]  ;;  %v1688_v11 = vld [vmem:[#allocation2 + $0x10] sm:$0xf0] }
 0x228   :  { %v1687_v36 = vor.u32 %v1958_v50, %v1686_v58  ;;  %v1691_v24 = vor.u32 %v1956_v0, %v1688_v11 }
 0x22a   :  { %767 = vmatpush.bf16.msrb.mxu0 %v1687_v36  ;;  %780 = vmatpush.bf16.msrb.mxu1 %v1691_v24  ;;  %v2855_v24 = vld [vmem:[%s3292_s1 + $0xe8] sm:$0xff] }
 0x22d   :  { %1764 = vmatmul.msk.bf16.vlgmr.msrb.gmra.mxu0 %vm370_vm9, %v636_v8  ;;  %1765 = vmatmul.msk.bf16.vlgmr.msrb.gmra.mxu1 %vm370_vm9, %v636_v8 }
 0x2a4   :  { %v2701_v21 = vpop.f32.mrf.mxu3  ;;  %v2703_v23 = vpop.f32.mrf.mxu2 }
 0x2a5   :  { %v899_v14 = vmul.f32 %v2025_v22, %v2701_v21  ;;  %v898_v1 = vmul.f32 %v2026_v57, %v2703_v23  ;;  %v2860_v22 = vld [vmem:[%s3292_s1 + $0x100] sm:$0xff]  ;;  %v2866_v57 = vld [vmem:[%s3292_s1 + $0xf8] sm:$0xff] }
 0x2a7   :  { %v997_v2 = vpack.c.bf16 %v899_v14, %v898_v1  ;;  %v2871_v1 = vld [vmem:[%s3292_s1 + $0xf0] sm:$0xff] }
 0x2a9   :  { %1001 = vst [vmem:[#allocation2 + $0x48] sm:$0xff] %v997_v2 }
 0x2aa   :  { %v2713_v35 = vpop.f32.mrf.mxu0  ;;  %v2715_v31 = vpop.f32.mrf.mxu1 }
 0x2ab   :  { %3313 = vst [vmem:[#allocation6_spill] sm:$0xff] %v2713_v35  ;;  %v896_v18 = vmul.f32 %v2713_v35, %v3315_v49  ;;  %v897_v28 = vmul.f32 %v2715_v31, %v3316_v26  ;;  %900 = vrot.lane.b32.xlu2 %v2713_v35, %s2030_s8  ;;  %960 = vrot.lane.b32.xlu1 %v2713_v35, %s2027_s27  ;;  %v2876_v49 = vld [vmem:[%s3292_s1 + $0x108] sm:$0xff] }
 0x2ac   :  { %3314 = vst [vmem:[#allocation7_spill] sm:$0xff] %v2715_v31  ;;  %942 = vrot.lane.b32.xlu0 %v2715_v31, %s2029_s29  ;;  %v810_v46 = vpop.f32.mrf.mxu3  ;;  %v797_v6 = vpop.f32.mrf.mxu2 }
 0x2ad   :  { %v996_v39 = vpack.c.bf16 %v897_v28, %v896_v18 }
 0x2af   :  { %1000 = vst [vmem:[#allocation2 + $0x40] sm:$0xff] %v996_v39 }
 0x2b2   :  { %v771_v56 = vpop.f32.mrf.mxu0  ;;  %v784_v47 = vpop.f32.mrf.mxu1 }
 0x2b3   :  { %920 = vrot.lane.b32.xlu1 %v2713_v35, %s2028_s28  ;;  %922 = vrot.lane.b32.xlu2 %v2715_v31, %s2028_s28 }
 0x2b4   :  { %966 = vrot.lane.b32.xlu0 %v2701_v21, %s2027_s27 }
 0x2bb   :  { %940 = vrot.lane.b32.xlu1 %v2713_v35, %s2029_s29  ;;  %814 = vrot.lane.b32.xlu2 %v2715_v31, %s2033_s10 }
 0x2bc   :  { %926 = vrot.lane.b32.xlu0 %v2701_v21, %s2028_s28 }
 0x2c3   :  { %834 = vrot.lane.b32.xlu2 %v2715_v31, %s2034_s11  ;;  %962 = vrot.lane.b32.xlu1 %v2715_v31, %s2027_s27 }
 0x2c4   :  { %946 = vrot.lane.b32.xlu0 %v2701_v21, %s2029_s29 }
 0x2cb   :  { %964 = vrot.lane.b32.xlu2 %v2703_v23, %s2027_s27  ;;  %854 = vrot.lane.b32.xlu1 %v2715_v31, %s2031_s0 }
 0x2cc   :  { %904 = vrot.lane.b32.xlu0 %v2703_v23, %s2030_s8 }
 0x2d3   :  { %924 = vrot.lane.b32.xlu2 %v2703_v23, %s2028_s28  ;;  %874 = vrot.lane.b32.xlu1 %v2715_v31, %s2032_s9 }
 0x2d4   :  { %858 = vrot.lane.b32.xlu0 %v2701_v21, %s2031_s0 }
 0x2db   :  { %944 = vrot.lane.b32.xlu2 %v2703_v23, %s2029_s29  ;;  %902 = vrot.lane.b32.xlu1 %v2715_v31, %s2030_s8 }
 0x2dc   :  { %878 = vrot.lane.b32.xlu0 %v2701_v21, %s2032_s9 }
 0x2e3   :  { %856 = vrot.lane.b32.xlu2 %v2703_v23, %s2031_s0  ;;  %906 = vrot.lane.b32.xlu1 %v2701_v21, %s2030_s8 }
 0x2e4   :  { %816 = vrot.lane.b32.xlu0 %v2703_v23, %s2033_s10 }
 0x2eb   :  { %876 = vrot.lane.b32.xlu2 %v2703_v23, %s2032_s9  ;;  %818 = vrot.lane.b32.xlu1 %v2701_v21, %s2033_s10 }
 0x2ec   :  { %836 = vrot.lane.b32.xlu0 %v2703_v23, %s2034_s11 }
 0x2f3   :  { %852 = vrot.lane.b32.xlu2 %v2713_v35, %s2031_s0  ;;  %838 = vrot.lane.b32.xlu1 %v2701_v21, %s2034_s11 }
 0x2f4   :  { %872 = vrot.lane.b32.xlu0 %v2713_v35, %s2032_s9 }
 0x2fb   :  { %832 = vrot.lane.b32.xlu2 %v2713_v35, %s2034_s11  ;;  %812 = vrot.lane.b32.xlu1 %v2713_v35, %s2033_s10 }
 0x305   :  { %v2785_v42 = vpop.permute.xlu2 %900 }
 0x30d   :  { %v923_v41 = vpop.permute.xlu2 %922 }
 0x315   :  { %v2787_v33 = vpop.permute.xlu2 %814 }
 0x31d   :  { %v961_v30 = vpop.permute.xlu1 %960  ;;  %v2790_v20 = vpop.permute.xlu2 %834 }
 0x31e   :  { %v943_v10 = vpop.permute.xlu0 %942 }
 0x325   :  { %v921_v62 = vpop.permute.xlu1 %920  ;;  %v965_v32 = vpop.permute.xlu2 %964 }
 0x326   :  { %v967_v13 = vpop.permute.xlu0 %966  ;;  %v930_v4 = vsel %vm155_vm1, %v921_v62, %v923_v41 }
 0x327   :  { %v971_v48 = vsel %vm197_vm2, %v967_v13, %v961_v30  ;;  %v968_v12 = vsel %vm197_vm2, %v965_v32, %v967_v13  ;;  %v936_v7 = vmul.f32 %v2816_v27, %v930_v4 }
 0x328   :  { %v979_v37 = vmul.f32 %v2795_v38, %v971_v48  ;;  %v978_v52 = vmul.f32 %v2800_v9, %v968_v12 }
 0x32a   :  { %v1013_v40 = vpack.c.bf16 %v979_v37, %v978_v52 }
 0x32c   :  { %1015 = vst [vmem:[#allocation2 + $0x88] sm:$0xff] %v1013_v40 }
 0x32d   :  { %v941_v3 = vpop.permute.xlu1 %940  ;;  %v925_v29 = vpop.permute.xlu2 %924 }
 0x32e   :  { %v927_v17 = vpop.permute.xlu0 %926  ;;  %v929_v45 = vsel %vm155_vm1, %v923_v41, %v925_v29  ;;  %v950_v34 = vsel %vm176_vm3, %v941_v3, %v943_v10 }
 0x32f   :  { %v931_v60 = vsel %vm155_vm1, %v927_v17, %v921_v62  ;;  %v928_v8 = vsel %vm155_vm1, %v925_v29, %v927_v17  ;;  %v937_v63 = vmul.f32 %v2823_v51, %v929_v45  ;;  %v956_v14 = vmul.f32 %v2848_v44, %v950_v34  ;;  %v2898_v45 = vld [vmem:[%s3292_s1 + $0x50] sm:$0xff] }
 0x330   :  { %v939_v55 = vmul.f32 %v2828_v59, %v931_v60  ;;  %v938_v15 = vmul.f32 %v2833_v54, %v928_v8  ;;  %v2905_v60 = vld [vmem:[%s3292_s1 + $0x58] sm:$0xff] }
 0x331   :  { %v1004_v19 = vpack.c.bf16 %v937_v63, %v936_v7 }
 0x332   :  { %v1005_v58 = vpack.c.bf16 %v939_v55, %v938_v15 }
 0x333   :  { %1008 = vst [vmem:[#allocation2 + $0x60] sm:$0xff] %v1004_v19  ;;  %v1842_v50 = vld [vmem:[#allocation2 + $0x88] sm:$0xf]  ;;  %v1993_v0 = vld [vmem:[#allocation2 + $0x8c] sm:$0xf] }
 0x334   :  { %1009 = vst [vmem:[#allocation2 + $0x68] sm:$0xff] %v1005_v58  ;;  %v1843_v11 = vor.u32 %v1995_v53, %v1842_v50  ;;  %v1847_v36 = vor.u32 %v1993_v0, %v1844_v25 }
 0x335   :  { %v945_v2 = vpop.permute.xlu2 %944  ;;  %v963_v18 = vpop.permute.xlu1 %962 }
 0x336   :  { %v947_v26 = vpop.permute.xlu0 %946  ;;  %1171 = vmatpush.bf16.msra.mxu2 %v1843_v11  ;;  %1184 = vmatpush.bf16.msra.mxu3 %v1847_v36  ;;  %v949_v28 = vsel %vm176_vm3, %v943_v10, %v945_v2  ;;  %v969_v46 = vsel %vm197_vm2, %v963_v18, %v965_v32  ;;  %v970_v6 = vsel %vm197_vm2, %v961_v30, %v963_v18  ;;  %v2918_v18 = vld [vmem:[%s3292_s1 + $0x40] sm:$0xff] }
 0x337   :  { %v951_v39 = vsel %vm176_vm3, %v947_v26, %v941_v3  ;;  %v948_v56 = vsel %vm176_vm3, %v945_v2, %v947_v26  ;;  %v957_v47 = vmul.f32 %v2855_v24, %v949_v28  ;;  %v976_v41 = vmul.f32 %v2860_v22, %v970_v6  ;;  %v2923_v26 = vld [vmem:[%s3292_s1 + $0x48] sm:$0xff]  ;;  %v2928_v28 = vld [vmem:[%s3292_s1 + $0xa0] sm:$0xff] }
 0x338   :  { %v959_v53 = vmul.f32 %v2866_v57, %v951_v39  ;;  %v958_v25 = vmul.f32 %v2871_v1, %v948_v56  ;;  %v977_v43 = vmul.f32 %v2876_v49, %v969_v46  ;;  %v2933_v46 = vld [vmem:[%s3292_s1 + $0x70] sm:$0xff]  ;;  %v2941_v39 = vld [vmem:[%s3292_s1 + $0x78] sm:$0xff] }
 0x339   :  { %v1006_v10 = vpack.c.bf16 %v957_v47, %v956_v14  ;;  %v2946_v47 = vld [vmem:[%s3292_s1 + $0xa8] sm:$0xff] }
 0x33a   :  { %v1007_v62 = vpack.c.bf16 %v959_v53, %v958_v25  ;;  %v1012_v32 = vpack.c.bf16 %v977_v43, %v976_v41  ;;  %v1818_v36 = vld [vmem:[#allocation2 + $0x60] sm:$0xf] }
 0x33b   :  { %1010 = vst [vmem:[#allocation2 + $0x70] sm:$0xff] %v1006_v10  ;;  %v1826_v12 = vld [vmem:[#allocation2 + $0x68] sm:$0xf]  ;;  %v1989_v52 = vld [vmem:[#allocation2 + $0x6c] sm:$0xf] }
 0x33c   :  { %1011 = vst [vmem:[#allocation2 + $0x78] sm:$0xff] %v1007_v62 }
 0x33d   :  { %1014 = vst [vmem:[#allocation2 + $0x80] sm:$0xff] %v1012_v32  ;;  %v857_v30 = vpop.permute.xlu2 %856  ;;  %v855_v13 = vpop.permute.xlu1 %854 }
 0x33e   :  { %v2893_v48 = vpop.permute.xlu0 %904  ;;  %v861_v7 = vsel %vm84_vm5, %v855_v13, %v857_v30 }
 0x33f   :  { %v870_v0 = vmul.f32 %v2898_v45, %v861_v7  ;;  %v2977_v7 = vld [vmem:[%s3292_s1 + $0xb8] sm:$0xff] }
 0x342   :  { %v1990_v34 = vld [vmem:[#allocation2 + $0x6c] sm:$0xf0]  ;;  %v1820_v58 = vld [vmem:[#allocation2 + $0x70] sm:$0xf0] }
 0x343   :  { %v1991_v37 = vld [vmem:[#allocation2 + $0x74] sm:$0xf0]  ;;  %v1828_v40 = vld [vmem:[#allocation2 + $0x78] sm:$0xf0]  ;;  %v1819_v14 = vor.u32 %v1990_v34, %v1818_v36  ;;  %v1984_v36 = vld [vmem:[#allocation2 + $0x44] sm:$0xf] }
 0x344   :  { %v1827_v4 = vor.u32 %v1991_v37, %v1826_v12  ;;  %v1831_v3 = vor.u32 %v1989_v52, %v1828_v40  ;;  %v1834_v29 = vld [vmem:[#allocation2 + $0x80] sm:$0xf]  ;;  %v1992_v17 = vld [vmem:[#allocation2 + $0x84] sm:$0xf] }
 0x345   :  { %v877_v8 = vpop.permute.xlu2 %876  ;;  %v1835_v63 = vor.u32 %v2802_v61, %v1834_v29  ;;  %v1839_v55 = vor.u32 %v1992_v17, %v2804_v5  ;;  %v2909_v15 = vpop.permute.xlu1 %874  ;;  %v1988_v61 = vld [vmem:[#allocation2 + $0x64] sm:$0xf]  ;;  %v2972_v17 = vld [vmem:[%s3292_s1 + $0xb0] sm:$0xff] }
 0x346   :  { %v859_v19 = vpop.permute.xlu0 %858  ;;  %1172 = vmatpush.bf16.msra.mxu2 %v1827_v4  ;;  %1185 = vmatpush.bf16.msra.mxu3 %v1831_v3  ;;  %v1823_v5 = vor.u32 %v1988_v61, %v1820_v58  ;;  %v881_v6 = vsel %vm105_vm6, %v2909_v15, %v877_v8 }
 0x347   :  { %v860_v50 = vsel %vm84_vm5, %v857_v30, %v859_v19  ;;  %1145 = vmatpush.bf16.msra.mxu0 %v1835_v63  ;;  %1158 = vmatpush.bf16.msra.mxu1 %v1839_v55  ;;  %v890_v37 = vmul.f32 %v2933_v46, %v881_v6 }
 0x348   :  { %v871_v11 = vmul.f32 %v2905_v60, %v860_v50 }
 0x34a   :  { %v989_v2 = vpack.c.bf16 %v871_v11, %v870_v0  ;;  %v2990_v0 = vld [vmem:[%s3292_s1 + $0x10] sm:$0xff]  ;;  %v1802_v11 = vld [vmem:[#allocation2 + $0x40] sm:$0xf] }
 0x34b   :  { %1146 = vmatpush.bf16.msra.mxu0 %v1819_v14  ;;  %1159 = vmatpush.bf16.msra.mxu1 %v1823_v5 }
 0x34c   :  { %993 = vst [vmem:[#allocation2 + $0x28] sm:$0xff] %v989_v2 }
 0x34d   :  { %v853_v56 = vpop.permute.xlu2 %852  ;;  %v903_v41 = vpop.permute.xlu1 %902 }
 0x34e   :  { %v2948_v53 = vpop.permute.xlu0 %878  ;;  %v862_v25 = vsel %vm84_vm5, %v853_v56, %v855_v13  ;;  %v863_v43 = vsel %vm84_vm5, %v859_v19, %v853_v56  ;;  %v909_v10 = vsel %vm134_vm4, %v903_v41, %v2893_v48  ;;  %v910_v62 = vsel %vm134_vm4, %v2785_v42, %v903_v41 }
 0x34f   :  { %v880_v32 = vsel %vm105_vm6, %v877_v8, %v2948_v53  ;;  %v868_v30 = vmul.f32 %v2918_v18, %v863_v43  ;;  %v869_v12 = vmul.f32 %v2923_v26, %v862_v25  ;;  %v916_v13 = vmul.f32 %v2928_v28, %v910_v62  ;;  %v3007_v62 = vld [vmem:[%s3292_s1 + $0x28] sm:$0xff] }
 0x350   :  { %v891_v52 = vmul.f32 %v2941_v39, %v880_v32  ;;  %v917_v40 = vmul.f32 %v2946_v47, %v909_v10 }
 0x351   :  { %v988_v4 = vpack.c.bf16 %v869_v12, %v868_v30  ;;  %v1810_v30 = vld [vmem:[#allocation2 + $0x48] sm:$0xf]  ;;  %v1985_v12 = vld [vmem:[#allocation2 + $0x4c] sm:$0xf] }
 0x352   :  { %v991_v3 = vpack.c.bf16 %v891_v52, %v890_v37  ;;  %v998_v29 = vpack.c.bf16 %v917_v40, %v916_v13 }
 0x353   :  { %992 = vst [vmem:[#allocation2 + $0x20] sm:$0xff] %v988_v4  ;;  %v3015_v4 = vld [vmem:[%s3292_s1 + $0x30] sm:$0xff] }
 0x354   :  { %995 = vst [vmem:[#allocation2 + $0x38] sm:$0xff] %v991_v3 }
 0x355   :  { %1002 = vst [vmem:[#allocation2 + $0x50] sm:$0xff] %v998_v29  ;;  %v907_v8 = vpop.permute.xlu1 %906  ;;  %v833_v43 = vpop.permute.xlu2 %832 }
 0x356   :  { %v817_v63 = vpop.permute.xlu0 %816  ;;  %v908_v55 = vsel %vm134_vm4, %v2893_v48, %v907_v8  ;;  %v911_v19 = vsel %vm134_vm4, %v907_v8, %v2785_v42  ;;  %v2998_v42 = vld [vmem:[%s3292_s1 + $0x18] sm:$0xff]  ;;  %v842_v13 = vsel %vm63_vm8, %v833_v43, %v2790_v20 }
 0x357   :  { %v918_v34 = vmul.f32 %v2972_v17, %v908_v55  ;;  %v919_v58 = vmul.f32 %v2977_v7, %v911_v19  ;;  %v821_v48 = vsel %vm42_vm7, %v2787_v33, %v817_v63  ;;  %v3023_v55 = vld [vmem:[%s3292_s1 + $0x20] sm:$0xff]  ;;  %v3028_v19 = vld [vmem:[%s3292_s1 + $0x38] sm:$0xff] }
 0x358   :  { %v830_v25 = vmul.f32 %v2990_v0, %v821_v48  ;;  %v1981_v48 = vld [vmem:[#allocation2 + $0x2c] sm:$0xf] }
 0x359   :  { %v999_v50 = vpack.c.bf16 %v919_v58, %v918_v34  ;;  %v1794_v34 = vld [vmem:[#allocation2 + $0x28] sm:$0xf]  ;;  %v849_v58 = vmul.f32 %v3007_v62, %v842_v13 }
 0x35b   :  { %1003 = vst [vmem:[#allocation2 + $0x58] sm:$0xff] %v999_v50  ;;  %v1983_v40 = vld [vmem:[#allocation2 + $0x34] sm:$0xf0]  ;;  %v3039_v50 = vld [vmem:[%s3292_s1 + $0x68] sm:$0xff] }
 0x35c   :  { %v1986_v61 = vld [vmem:[#allocation2 + $0x4c] sm:$0xf0]  ;;  %v1804_v14 = vld [vmem:[#allocation2 + $0x50] sm:$0xf0] }
 0x35d   :  { %v819_v5 = vpop.permute.xlu1 %818  ;;  %v1803_v2 = vor.u32 %v1986_v61, %v1802_v11  ;;  %v1807_v6 = vor.u32 %v1984_v36, %v1804_v14  ;;  %v1795_v36 = vor.u32 %v1983_v40, %v1794_v34  ;;  %v1786_v34 = vld [vmem:[#allocation2 + $0x20] sm:$0xf] }
 0x35e   :  { %v837_v56 = vpop.permute.xlu0 %836  ;;  %v820_v41 = vsel %vm42_vm7, %v817_v63, %v819_v5  ;;  %v1796_v63 = vld [vmem:[#allocation2 + $0x38] sm:$0xf0] }
 0x35f   :  { %v831_v10 = vmul.f32 %v2998_v42, %v820_v41  ;;  %1147 = vmatpush.bf16.msra.mxu0 %v1803_v2  ;;  %1160 = vmatpush.bf16.msra.mxu1 %v1807_v6  ;;  %v841_v3 = vsel %vm63_vm8, %v2790_v20, %v837_v56  ;;  %v3034_v20 = vld [vmem:[%s3292_s1 + $0x60] sm:$0xff]  ;;  %v1799_v41 = vor.u32 %v1981_v48, %v1796_v63 }
 0x360   :  { %v850_v61 = vmul.f32 %v3015_v4, %v841_v3 }
 0x361   :  { %v981_v32 = vpack.c.bf16 %v831_v10, %v830_v25 }
 0x362   :  { %v1987_v37 = vld [vmem:[#allocation2 + $0x54] sm:$0xf0]  ;;  %v1812_v52 = vld [vmem:[#allocation2 + $0x58] sm:$0xf0] }
 0x363   :  { %985 = vst [vmem:[#allocation2 + $0x8] sm:$0xff] %v981_v32  ;;  %v1811_v29 = vor.u32 %v1987_v37, %v1810_v30  ;;  %v1815_v8 = vor.u32 %v1985_v12, %v1812_v52 }
 0x365   :  { %1173 = vmatpush.bf16.msra.mxu2 %v1811_v29  ;;  %1186 = vmatpush.bf16.msra.mxu3 %v1815_v8  ;;  %v839_v11 = vpop.permute.xlu1 %838 }
 0x366   :  { %v873_v14 = vpop.permute.xlu0 %872  ;;  %v840_v2 = vsel %vm63_vm8, %v837_v56, %v839_v11  ;;  %v843_v6 = vsel %vm63_vm8, %v839_v11, %v833_v43 }
 0x367   :  { %v882_v25 = vsel %vm105_vm6, %v873_v14, %v2909_v15  ;;  %v883_v10 = vsel %vm105_vm6, %v2948_v53, %v873_v14  ;;  %v848_v32 = vmul.f32 %v3023_v55, %v843_v6  ;;  %v851_v30 = vmul.f32 %v3028_v19, %v840_v2  ;;  %v3059_v15 = vld [vmem:[%s3292_s1] sm:$0xff]  ;;  %v3064_v53 = vld [vmem:[%s3292_s1 + $0x8] sm:$0xff] }
 0x368   :  { %v888_v12 = vmul.f32 %v3034_v20, %v883_v10  ;;  %v889_v56 = vmul.f32 %v3039_v50, %v882_v25  ;;  %v1018_v10 = vld [vmem:[%s3295_s4] sm:$0xf] }
 0x369   :  { %v982_v13 = vpack.c.bf16 %v849_v58, %v848_v32  ;;  %v983_v37 = vpack.c.bf16 %v851_v30, %v850_v61  ;;  %1174 = vmatpush.bf16.msra.mxu2 %v1795_v36  ;;  %1187 = vmatpush.bf16.msra.mxu3 %v1799_v41  ;;  %v1980_v58 = vld [vmem:[#allocation2 + $0x24] sm:$0xf] }
 0x36a   :  { %v990_v43 = vpack.c.bf16 %v889_v56, %v888_v12  ;;  %v1778_v11 = vld [vmem:[#allocation2 + $0x8] sm:$0xf]  ;;  %v1977_v6 = vld [vmem:[#allocation2 + $0xc] sm:$0xf] }
 0x36b   :  { %986 = vst [vmem:[#allocation2 + $0x10] sm:$0xff] %v982_v13 }
 0x36c   :  { %994 = vst [vmem:[#allocation2 + $0x30] sm:$0xff] %v990_v43  ;;  %v1278_v43 = vld [vmem:[%s3292_s1 + $0x80] sm:$0xff] }
 0x36d   :  { %987 = vst [vmem:[#allocation2 + $0x18] sm:$0xff] %v983_v37  ;;  %v813_v52 = vpop.permute.xlu1 %812 }
 0x36e   :  { %v822_v40 = vsel %vm42_vm7, %v813_v52, %v2787_v33  ;;  %v823_v3 = vsel %vm42_vm7, %v819_v5, %v813_v52 }
 0x36f   :  { %v828_v29 = vmul.f32 %v3059_v15, %v823_v3  ;;  %v829_v8 = vmul.f32 %v3064_v53, %v822_v40  ;;  %v1279_v40 = vld [vmem:[%s3292_s1 + $0x88] sm:$0xff] }
 0x371   :  { %v980_v63 = vpack.c.bf16 %v829_v8, %v828_v29 }
 0x372   :  { %v1978_v5 = vld [vmem:[#allocation2 + $0xc] sm:$0xf0]  ;;  %v1772_v12 = vld [vmem:[#allocation2 + $0x10] sm:$0xf0] }
 0x373   :  { %984 = vst [vmem:[#allocation2] sm:$0xff] %v980_v63  ;;  %v1982_v36 = vld [vmem:[#allocation2 + $0x2c] sm:$0xf0]  ;;  %v1788_v48 = vld [vmem:[#allocation2 + $0x30] sm:$0xf0]  ;;  %v1281_v63 = vld [vmem:[%s3292_s1 + $0x98] sm:$0xff] }
 0x374   :  { %v1787_v61 = vor.u32 %v1982_v36, %v1786_v34  ;;  %v1791_v14 = vor.u32 %v1980_v58, %v1788_v48  ;;  %v1979_v2 = vld [vmem:[#allocation2 + $0x14] sm:$0xf0]  ;;  %v1780_v41 = vld [vmem:[#allocation2 + $0x18] sm:$0xf0]  ;;  %v1280_v58 = vld [vmem:[%s3292_s1 + $0x90] sm:$0xff] }
 0x375   :  { %v1779_v33 = vor.u32 %v1979_v2, %v1778_v11  ;;  %v1783_v25 = vor.u32 %v1977_v6, %v1780_v41 }
 0x376   :  { %1148 = vmatpush.bf16.msra.mxu0 %v1787_v61  ;;  %1161 = vmatpush.bf16.msra.mxu1 %v1791_v14 }
 0x377   :  { %1175 = vmatpush.bf16.msra.mxu2 %v1779_v33  ;;  %1188 = vmatpush.bf16.msra.mxu3 %v1783_v25 }
 0x37a   :  { %v1770_v32 = vld [vmem:[#allocation2] sm:$0xf]  ;;  %v1976_v30 = vld [vmem:[#allocation2 + $0x4] sm:$0xf]  ;;  %1851 = vmatmul.msk.bf16.vlgmr.msra.gmra.mxu3 %vm370_vm9, %v1018_v10  ;;  %1850 = vmatmul.msk.bf16.vlgmr.msra.gmra.mxu2 %vm370_vm9, %v1018_v10 }
 0x37b   :  { %v1771_v56 = vor.u32 %v1978_v5, %v1770_v32  ;;  %v1775_v13 = vor.u32 %v1976_v30, %v1772_v12 }
 0x37d   :  { %1149 = vmatpush.bf16.msra.mxu0 %v1771_v56  ;;  %1162 = vmatpush.bf16.msra.mxu1 %v1775_v13 }
 0x380   :  { %1848 = vmatmul.msk.bf16.vlgmr.msra.gmra.mxu0 %vm370_vm9, %v1018_v10  ;;  %1849 = vmatmul.msk.bf16.vlgmr.msra.gmra.mxu1 %vm370_vm9, %v1018_v10 }
 0x3fd   :  { %v1151_v37 = vpop.f32.mrf.mxu0  ;;  %v1164_v52 = vpop.f32.mrf.mxu1 }
 0x3fe   :  { %v1194_v3 = vmax.f32 %v1151_v37, 0.0  ;;  %v1195_v29 = vmax.f32 %v1164_v52, 0.0  ;;  %v1190_v8 = vpop.f32.mrf.mxu3  ;;  %v1177_v34 = vpop.f32.mrf.mxu2 }
 0x3ff   :  { %v1197_v11 = vmax.f32 %v1190_v8, 0.0  ;;  %v1196_v36 = vmax.f32 %v1177_v34, 0.0 }
 0x400   :  { %v1282_v48 = vmul.f32 %v1278_v43, %v1194_v3  ;;  %v1283_v61 = vmul.f32 %v1279_v40, %v1195_v29  ;;  %1286 = vrot.lane.b32.xlu1 %v1194_v3, %s2030_s8  ;;  %1346 = vrot.lane.b32.xlu0 %v1194_v3, %s2027_s27 }
 0x401   :  { %1328 = vrot.lane.b32.xlu2 %v1195_v29, %s2029_s29  ;;  %v1285_v14 = vmul.f32 %v1281_v63, %v1197_v11  ;;  %v1284_v2 = vmul.f32 %v1280_v58, %v1196_v36 }
 0x402   :  { %v1382_v6 = vpack.c.bf16 %v1283_v61, %v1282_v48 }
 0x403   :  { %v1383_v41 = vpack.c.bf16 %v1285_v14, %v1284_v2 }
 0x404   :  { %1386 = vst [vmem:[#allocation2 + $0x40] sm:$0xff] %v1382_v6 }
 0x405   :  { %v1153_v33 = vpop.f32.mrf.mxu0  ;;  %v1166_v25 = vpop.f32.mrf.mxu1  ;;  %1387 = vst [vmem:[#allocation2 + $0x48] sm:$0xff] %v1383_v41 }
 0x406   :  { %v1179_v5 = vpop.f32.mrf.mxu2  ;;  %v1192_v10 = vpop.f32.mrf.mxu3 }
 0x408   :  { %1306 = vrot.lane.b32.xlu0 %v1194_v3, %s2028_s28  ;;  %1308 = vrot.lane.b32.xlu1 %v1195_v29, %s2028_s28 }
 0x409   :  { %1352 = vrot.lane.b32.xlu2 %v1197_v11, %s2027_s27 }
 0x410   :  { %1326 = vrot.lane.b32.xlu0 %v1194_v3, %s2029_s29  ;;  %1200 = vrot.lane.b32.xlu1 %v1195_v29, %s2033_s10 }
 0x411   :  { %1312 = vrot.lane.b32.xlu2 %v1197_v11, %s2028_s28 }
 0x418   :  { %1220 = vrot.lane.b32.xlu1 %v1195_v29, %s2034_s11  ;;  %1348 = vrot.lane.b32.xlu0 %v1195_v29, %s2027_s27 }
 0x419   :  { %1332 = vrot.lane.b32.xlu2 %v1197_v11, %s2029_s29 }
 0x420   :  { %1350 = vrot.lane.b32.xlu1 %v1196_v36, %s2027_s27  ;;  %1240 = vrot.lane.b32.xlu0 %v1195_v29, %s2031_s0 }
 0x421   :  { %1290 = vrot.lane.b32.xlu2 %v1196_v36, %s2030_s8 }
 0x428   :  { %1310 = vrot.lane.b32.xlu1 %v1196_v36, %s2028_s28  ;;  %1260 = vrot.lane.b32.xlu0 %v1195_v29, %s2032_s9 }
 0x429   :  { %1244 = vrot.lane.b32.xlu2 %v1197_v11, %s2031_s0 }
 0x430   :  { %1330 = vrot.lane.b32.xlu1 %v1196_v36, %s2029_s29  ;;  %1288 = vrot.lane.b32.xlu0 %v1195_v29, %s2030_s8 }
 0x431   :  { %1264 = vrot.lane.b32.xlu2 %v1197_v11, %s2032_s9 }
 0x438   :  { %1242 = vrot.lane.b32.xlu1 %v1196_v36, %s2031_s0  ;;  %1292 = vrot.lane.b32.xlu0 %v1197_v11, %s2030_s8 }
 0x439   :  { %1202 = vrot.lane.b32.xlu2 %v1196_v36, %s2033_s10 }
 0x440   :  { %1262 = vrot.lane.b32.xlu1 %v1196_v36, %s2032_s9  ;;  %1204 = vrot.lane.b32.xlu0 %v1197_v11, %s2033_s10 }
 0x441   :  { %1222 = vrot.lane.b32.xlu2 %v1196_v36, %s2034_s11 }
 0x448   :  { %1238 = vrot.lane.b32.xlu1 %v1194_v3, %s2031_s0  ;;  %1224 = vrot.lane.b32.xlu0 %v1197_v11, %s2034_s11 }
 0x449   :  { %1258 = vrot.lane.b32.xlu2 %v1194_v3, %s2032_s9 }
 0x450   :  { %1218 = vrot.lane.b32.xlu1 %v1194_v3, %s2034_s11  ;;  %1198 = vrot.lane.b32.xlu0 %v1194_v3, %s2033_s10 }
 0x45b   :  { %v3124_v32 = vpop.permute.xlu2 %1328 }
 0x463   :  { %v1353_v30 = vpop.permute.xlu2 %1352 }
 0x46b   :  { %v1313_v12 = vpop.permute.xlu2 %1312 }
 0x472   :  { %v3126_v56 = vpop.permute.xlu1 %1286  ;;  %v1347_v13 = vpop.permute.xlu0 %1346 }
 0x473   :  { %v3128_v37 = vpop.permute.xlu2 %1332  ;;  %v1357_v11 = vsel %vm197_vm2, %v1353_v30, %v1347_v13 }
 0x474   :  { %v1365_v41 = vmul.f32 %v1357_v11, %v2795_v38 }
 0x47a   :  { %v1307_v43 = vpop.permute.xlu0 %1306  ;;  %v1309_v52 = vpop.permute.xlu1 %1308 }
 0x47b   :  { %v3130_v40 = vpop.permute.xlu2 %1290  ;;  %v1317_v31 = vsel %vm155_vm1, %v1313_v12, %v1307_v43 }
 0x482   :  { %v1327_v29 = vpop.permute.xlu0 %1326  ;;  %v3132_v8 = vpop.permute.xlu1 %1200 }
 0x483   :  { %v3134_v63 = vpop.permute.xlu2 %1244 }
 0x48a   :  { %v3136_v34 = vpop.permute.xlu1 %1220  ;;  %v1349_v3 = vpop.permute.xlu0 %1348 }
 0x48b   :  { %v3138_v58 = vpop.permute.xlu2 %1264  ;;  %v1356_v36 = vsel %vm197_vm2, %v1347_v13, %v1349_v3 }
 0x48c   :  { %v1362_v33 = vmul.f32 %v1356_v36, %v2860_v22 }
 0x492   :  { %v1351_v48 = vpop.permute.xlu1 %1350  ;;  %v3144_v61 = vpop.permute.xlu0 %1240 }
 0x493   :  { %v3146_v14 = vpop.permute.xlu2 %1202  ;;  %v1354_v2 = vsel %vm197_vm2, %v1351_v48, %v1353_v30  ;;  %v1355_v6 = vsel %vm197_vm2, %v1349_v3, %v1351_v48  ;;  %v1316_v30 = vsel %vm155_vm1, %v1307_v43, %v1309_v52  ;;  %v2014_v48 = vld [vmem:[#allocation2 + $0x8c] sm:$0xf0] }
 0x494   :  { %v1363_v25 = vmul.f32 %v1355_v6, %v2876_v49  ;;  %v1364_v5 = vmul.f32 %v1354_v2, %v2800_v9  ;;  %v1325_v49 = vmul.f32 %v1317_v31, %v2828_v59  ;;  %v1322_v11 = vmul.f32 %v1316_v30, %v2816_v27  ;;  %v1920_v2 = vld [vmem:[#allocation2 + $0x90] sm:$0xf0] }
 0x496   :  { %v1398_v10 = vpack.c.bf16 %v1363_v25, %v1362_v33  ;;  %v1399_v13 = vpack.c.bf16 %v1365_v41, %v1364_v5  ;;  %v2015_v33 = vld [vmem:[#allocation2 + $0x94] sm:$0xf0]  ;;  %v1928_v25 = vld [vmem:[#allocation2 + $0x98] sm:$0xf0] }
 0x498   :  { %1400 = vst [vmem:[#allocation2 + $0x80] sm:$0xff] %v1398_v10 }
 0x499   :  { %1401 = vst [vmem:[#allocation2 + $0x88] sm:$0xff] %v1399_v13 }
 0x49a   :  { %v1311_v35 = vpop.permute.xlu1 %1310  ;;  %v3160_v3 = vpop.permute.xlu0 %1260 }
 0x49b   :  { %v3162_v38 = vpop.permute.xlu2 %1222  ;;  %v1314_v22 = vsel %vm155_vm1, %v1311_v35, %v1313_v12  ;;  %v1315_v9 = vsel %vm155_vm1, %v1309_v52, %v1311_v35  ;;  %v1336_v12 = vsel %vm176_vm3, %v1327_v29, %v3124_v32  ;;  %v1337_v35 = vsel %vm176_vm3, %v3128_v37, %v1327_v29 }
 0x49c   :  { %v1323_v36 = vmul.f32 %v1315_v9, %v2823_v51  ;;  %v1324_v43 = vmul.f32 %v1314_v22, %v2833_v54  ;;  %v1342_v13 = vmul.f32 %v1336_v12, %v2848_v44  ;;  %v1345_v30 = vmul.f32 %v1337_v35, %v2866_v57 }
 0x49e   :  { %v1390_v6 = vpack.c.bf16 %v1323_v36, %v1322_v11  ;;  %v1391_v41 = vpack.c.bf16 %v1325_v49, %v1324_v43 }
 0x49f   :  { %v1918_v31 = vld [vmem:[#allocation2 + $0x80] sm:$0xf]  ;;  %v2012_v27 = vld [vmem:[#allocation2 + $0x84] sm:$0xf] }
 0x4a0   :  { %1394 = vst [vmem:[#allocation2 + $0x60] sm:$0xff] %v1390_v6  ;;  %v1926_v51 = vld [vmem:[#allocation2 + $0x88] sm:$0xf]  ;;  %v2013_v59 = vld [vmem:[#allocation2 + $0x8c] sm:$0xf]  ;;  %v1919_v54 = vor.u32 %v2014_v48, %v1918_v31  ;;  %v1923_v52 = vor.u32 %v2012_v27, %v1920_v2 }
 0x4a1   :  { %1395 = vst [vmem:[#allocation2 + $0x68] sm:$0xff] %v1391_v41  ;;  %v1927_v5 = vor.u32 %v2015_v33, %v1926_v51  ;;  %v1931_v10 = vor.u32 %v2013_v59, %v1928_v25 }
 0x4a2   :  { %v1331_v22 = vpop.permute.xlu1 %1330  ;;  %1531 = vmatpush.bf16.msrb.mxu0 %v1919_v54  ;;  %1544 = vmatpush.bf16.msrb.mxu1 %v1923_v52  ;;  %v1289_v9 = vpop.permute.xlu0 %1288 }
 0x4a3   :  { %v1259_v49 = vpop.permute.xlu2 %1258  ;;  %1557 = vmatpush.bf16.msrb.mxu2 %v1927_v5  ;;  %1570 = vmatpush.bf16.msrb.mxu3 %v1931_v10  ;;  %v1334_v29 = vsel %vm176_vm3, %v1331_v22, %v3128_v37  ;;  %v1335_v11 = vsel %vm176_vm3, %v3124_v32, %v1331_v22  ;;  %v1295_v44 = vsel %vm134_vm4, %v1289_v9, %v3130_v40 }
 0x4a4   :  { %v1268_v57 = vsel %vm105_vm6, %v1259_v49, %v3160_v3  ;;  %v1269_v36 = vsel %vm105_vm6, %v3138_v58, %v1259_v49  ;;  %v1343_v43 = vmul.f32 %v1335_v11, %v2855_v24  ;;  %v1344_v37 = vmul.f32 %v1334_v29, %v2871_v1 }
 0x4a5   :  { %v1274_v48 = vmul.f32 %v1269_v36, %v3034_v20  ;;  %v1275_v32 = vmul.f32 %v1268_v57, %v3039_v50  ;;  %v1296_v2 = vsel %vm134_vm4, %v3126_v56, %v1289_v9  ;;  %v1303_v6 = vmul.f32 %v1295_v44, %v2946_v47  ;;  %v1886_v57 = vld [vmem:[#allocation2 + $0x40] sm:$0xf] }
 0x4a6   :  { %v1392_v41 = vpack.c.bf16 %v1343_v43, %v1342_v13  ;;  %v1393_v33 = vpack.c.bf16 %v1345_v30, %v1344_v37  ;;  %v1302_v25 = vmul.f32 %v1296_v2, %v2928_v28 }
 0x4a7   :  { %v1376_v12 = vpack.c.bf16 %v1275_v32, %v1274_v48  ;;  %v1902_v5 = vld [vmem:[#allocation2 + $0x60] sm:$0xf]  ;;  %v2008_v13 = vld [vmem:[#allocation2 + $0x64] sm:$0xf] }
 0x4a8   :  { %1396 = vst [vmem:[#allocation2 + $0x70] sm:$0xff] %v1392_v41  ;;  %v1384_v35 = vpack.c.bf16 %v1303_v6, %v1302_v25 }
 0x4a9   :  { %1380 = vst [vmem:[#allocation2 + $0x30] sm:$0xff] %v1376_v12 }
 0x4aa   :  { %1397 = vst [vmem:[#allocation2 + $0x78] sm:$0xff] %v1393_v33  ;;  %v1243_v24 = vpop.permute.xlu1 %1242  ;;  %v1293_v1 = vpop.permute.xlu0 %1292  ;;  %v2004_v33 = vld [vmem:[#allocation2 + $0x44] sm:$0xf] }
 0x4ab   :  { %1388 = vst [vmem:[#allocation2 + $0x50] sm:$0xff] %v1384_v35  ;;  %v1246_v20 = vsel %vm84_vm5, %v1243_v24, %v3134_v63  ;;  %v1247_v47 = vsel %vm84_vm5, %v3144_v61, %v1243_v24  ;;  %v1294_v28 = vsel %vm134_vm4, %v3130_v40, %v1293_v1  ;;  %v1297_v50 = vsel %vm134_vm4, %v1293_v1, %v3126_v56  ;;  %v1910_v56 = vld [vmem:[#allocation2 + $0x68] sm:$0xf]  ;;  %v2005_v35 = vld [vmem:[#allocation2 + $0x4c] sm:$0xf] }
 0x4ac   :  { %v1256_v31 = vmul.f32 %v1247_v47, %v2898_v45  ;;  %v1257_v27 = vmul.f32 %v1246_v20, %v2905_v60  ;;  %v1304_v51 = vmul.f32 %v1294_v28, %v2972_v17  ;;  %v1305_v59 = vmul.f32 %v1297_v50, %v2977_v7  ;;  %v2009_v45 = vld [vmem:[#allocation2 + $0x6c] sm:$0xf] }
 0x4ad   :  { %v1207_v40 = vsel %vm42_vm7, %v3132_v8, %v3146_v14 }
 0x4ae   :  { %v1375_v54 = vpack.c.bf16 %v1257_v27, %v1256_v31  ;;  %v1385_v52 = vpack.c.bf16 %v1305_v59, %v1304_v51  ;;  %v1216_v7 = vmul.f32 %v1207_v40, %v2990_v0 }
 0x4af   :  { %v2010_v10 = vld [vmem:[#allocation2 + $0x6c] sm:$0xf0]  ;;  %v1904_v30 = vld [vmem:[#allocation2 + $0x70] sm:$0xf0] }
 0x4b0   :  { %1379 = vst [vmem:[#allocation2 + $0x28] sm:$0xff] %v1375_v54  ;;  %v1903_v22 = vor.u32 %v2010_v10, %v1902_v5  ;;  %v1907_v60 = vor.u32 %v2008_v13, %v1904_v30 }
 0x4b1   :  { %1389 = vst [vmem:[#allocation2 + $0x58] sm:$0xff] %v1385_v52  ;;  %v2011_v17 = vld [vmem:[#allocation2 + $0x74] sm:$0xf0]  ;;  %v1912_v9 = vld [vmem:[#allocation2 + $0x78] sm:$0xf0] }
 0x4b2   :  { %v1911_v49 = vor.u32 %v2011_v17, %v1910_v56  ;;  %v1915_v29 = vor.u32 %v2009_v45, %v1912_v9  ;;  %v1263_v11 = vpop.permute.xlu1 %1262  ;;  %1532 = vmatpush.bf16.msrb.mxu0 %v1903_v22  ;;  %1545 = vmatpush.bf16.msrb.mxu1 %v1907_v60  ;;  %v1205_v44 = vpop.permute.xlu0 %1204  ;;  %v2006_v36 = vld [vmem:[#allocation2 + $0x4c] sm:$0xf0]  ;;  %v1888_v43 = vld [vmem:[#allocation2 + $0x50] sm:$0xf0] }
 0x4b3   :  { %v1266_v37 = vsel %vm105_vm6, %v1263_v11, %v3138_v58  ;;  %v1267_v48 = vsel %vm105_vm6, %v3160_v3, %v1263_v11  ;;  %v1206_v0 = vsel %vm42_vm7, %v3146_v14, %v1205_v44  ;;  %v1887_v32 = vor.u32 %v2006_v36, %v1886_v57  ;;  %v1894_v3 = vld [vmem:[#allocation2 + $0x48] sm:$0xf]  ;;  %v2002_v9 = vld [vmem:[#allocation2 + $0x2c] sm:$0xf0] }
 0x4b4   :  { %1558 = vmatpush.bf16.msrb.mxu2 %v1911_v49  ;;  %1571 = vmatpush.bf16.msrb.mxu3 %v1915_v29  ;;  %v1276_v2 = vmul.f32 %v1267_v48, %v2933_v46  ;;  %v1277_v6 = vmul.f32 %v1266_v37, %v2941_v39  ;;  %v1217_v41 = vmul.f32 %v1206_v0, %v2998_v42 }
 0x4b5   :  { %v1891_v25 = vor.u32 %v2004_v33, %v1888_v43  ;;  %v1227_v46 = vsel %vm63_vm8, %v3136_v34, %v3162_v38 }
 0x4b6   :  { %v1377_v58 = vpack.c.bf16 %v1277_v6, %v1276_v2  ;;  %v1367_v12 = vpack.c.bf16 %v1217_v41, %v1216_v7  ;;  %1533 = vmatpush.bf16.msrb.mxu0 %v1887_v32  ;;  %v1236_v31 = vmul.f32 %v1227_v46, %v3015_v4  ;;  %v1872_v7 = vld [vmem:[#allocation2 + $0x30] sm:$0xf0] }
 0x4b7   :  { %1546 = vmatpush.bf16.msrb.mxu1 %v1891_v25  ;;  %v1878_v52 = vld [vmem:[#allocation2 + $0x28] sm:$0xf]  ;;  %v2001_v40 = vld [vmem:[#allocation2 + $0x2c] sm:$0xf] }
 0x4b8   :  { %1381 = vst [vmem:[#allocation2 + $0x38] sm:$0xff] %v1377_v58  ;;  %v2007_v24 = vld [vmem:[#allocation2 + $0x54] sm:$0xf0]  ;;  %v1896_v14 = vld [vmem:[#allocation2 + $0x58] sm:$0xf0] }
 0x4b9   :  { %1371 = vst [vmem:[#allocation2 + $0x8] sm:$0xff] %v1367_v12  ;;  %v1895_v39 = vor.u32 %v2007_v24, %v1894_v3  ;;  %v1899_v1 = vor.u32 %v2005_v35, %v1896_v14 }
 0x4ba   :  { %v1239_v42 = vpop.permute.xlu1 %1238  ;;  %v1225_v20 = vpop.permute.xlu0 %1224 }
 0x4bb   :  { %v1248_v47 = vsel %vm84_vm5, %v1239_v42, %v3144_v61  ;;  %v1249_v28 = vsel %vm84_vm5, %v3134_v63, %v1239_v42  ;;  %1559 = vmatpush.bf16.msrb.mxu2 %v1895_v39  ;;  %1572 = vmatpush.bf16.msrb.mxu3 %v1899_v1  ;;  %v1226_v50 = vsel %vm63_vm8, %v3162_v38, %v1225_v20  ;;  %v3318_v39 = vld [vmem:[#allocation6_spill] sm:$0xff]  ;;  %v3319_v42 = vld [vmem:[#allocation7_spill] sm:$0xff] }
 0x4bc   :  { %v1254_v27 = vmul.f32 %v1249_v28, %v2918_v18  ;;  %v1255_v51 = vmul.f32 %v1248_v47, %v2923_v26  ;;  %v1237_v59 = vmul.f32 %v1226_v50, %v3028_v19 }
 0x4be   :  { %v1374_v54 = vpack.c.bf16 %v1255_v51, %v1254_v27  ;;  %v1369_v61 = vpack.c.bf16 %v1237_v59, %v1236_v31 }
 0x4bf   :  { %v2003_v5 = vld [vmem:[#allocation2 + $0x34] sm:$0xf0]  ;;  %v1880_v63 = vld [vmem:[#allocation2 + $0x38] sm:$0xf0] }
 0x4c0   :  { %1378 = vst [vmem:[#allocation2 + $0x20] sm:$0xff] %v1374_v54  ;;  %v1879_v10 = vor.u32 %v2003_v5, %v1878_v52  ;;  %v1883_v13 = vor.u32 %v2001_v40, %v1880_v63  ;;  %v1862_v49 = vld [vmem:[#allocation2 + $0x8] sm:$0xf]  ;;  %v1997_v57 = vld [vmem:[#allocation2 + $0xc] sm:$0xf] }
 0x4c1   :  { %1373 = vst [vmem:[#allocation2 + $0x18] sm:$0xff] %v1369_v61 }
 0x4c2   :  { %v1219_v30 = vpop.permute.xlu1 %1218  ;;  %1560 = vmatpush.bf16.msrb.mxu2 %v1879_v10  ;;  %1573 = vmatpush.bf16.msrb.mxu3 %v1883_v13  ;;  %v1199_v4 = vpop.permute.xlu0 %1198 }
 0x4c3   :  { %v1228_v18 = vsel %vm63_vm8, %v1219_v30, %v3136_v34  ;;  %v1229_v26 = vsel %vm63_vm8, %v1225_v20, %v1219_v30  ;;  %v1208_v19 = vsel %vm42_vm7, %v1199_v4, %v3132_v8  ;;  %v1209_v38 = vsel %vm42_vm7, %v1205_v44, %v1199_v4 }
 0x4c4   :  { %v1234_v56 = vmul.f32 %v1229_v26, %v3023_v55  ;;  %v1235_v45 = vmul.f32 %v1228_v18, %v3007_v62  ;;  %v1214_v22 = vmul.f32 %v1209_v38, %v3059_v15  ;;  %v1215_v60 = vmul.f32 %v1208_v19, %v3064_v53  ;;  %v1404_v15 = vld [vmem:[%s3296_s5] sm:$0xf] }
 0x4c6   :  { %v1368_v17 = vpack.c.bf16 %v1235_v45, %v1234_v56  ;;  %v1366_v34 = vpack.c.bf16 %v1215_v60, %v1214_v22 }
 0x4c7   :  { %v1870_v29 = vld [vmem:[#allocation2 + $0x20] sm:$0xf]  ;;  %v2000_v11 = vld [vmem:[#allocation2 + $0x24] sm:$0xf] }
 0x4c8   :  { %1372 = vst [vmem:[#allocation2 + $0x10] sm:$0xff] %v1368_v17  ;;  %v1871_v8 = vor.u32 %v2002_v9, %v1870_v29  ;;  %v1875_v16 = vor.u32 %v2000_v11, %v1872_v7  ;;  %v1999_v44 = vld [vmem:[#allocation2 + $0x14] sm:$0xf0]  ;;  %v1864_v36 = vld [vmem:[#allocation2 + $0x18] sm:$0xf0] }
 0x4c9   :  { %1370 = vst [vmem:[#allocation2] sm:$0xff] %v1366_v34  ;;  %v1863_v55 = vor.u32 %v1999_v44, %v1862_v49  ;;  %v1867_v62 = vor.u32 %v1997_v57, %v1864_v36 }
 0x4ca   :  { %1534 = vmatpush.bf16.msrb.mxu0 %v1871_v8  ;;  %1547 = vmatpush.bf16.msrb.mxu1 %v1875_v16 }
 0x4cb   :  { %1561 = vmatpush.bf16.msrb.mxu2 %v1863_v55  ;;  %1574 = vmatpush.bf16.msrb.mxu3 %v1867_v62 }
 0x4ce   :  { %1934 = vmatmul.msk.bf16.vlgmr.msrb.gmra.mxu2 %vm370_vm9, %v1404_v15  ;;  %1935 = vmatmul.msk.bf16.vlgmr.msrb.gmra.mxu3 %vm370_vm9, %v1404_v15 }
 0x4cf   :  { %v1998_v53 = vld [vmem:[#allocation2 + $0xc] sm:$0xf0]  ;;  %v1856_v43 = vld [vmem:[#allocation2 + $0x10] sm:$0xf0] }
 0x4d0   :  { %v1854_v37 = vld [vmem:[#allocation2] sm:$0xf]  ;;  %v1996_v48 = vld [vmem:[#allocation2 + $0x4] sm:$0xf] }
 0x4d1   :  { %v1855_v0 = vor.u32 %v1998_v53, %v1854_v37  ;;  %v1859_v32 = vor.u32 %v1996_v48, %v1856_v43 }
 0x4d3   :  { %1535 = vmatpush.bf16.msrb.mxu0 %v1855_v0  ;;  %1548 = vmatpush.bf16.msrb.mxu1 %v1859_v32 }
 0x4d6   :  { %1932 = vmatmul.msk.bf16.vlgmr.msrb.gmra.mxu0 %vm370_vm9, %v1404_v15  ;;  %1933 = vmatmul.msk.bf16.vlgmr.msrb.gmra.mxu1 %vm370_vm9, %v1404_v15 }
 0x551   :  { %v1563_v2 = vpop.f32.mrf.mxu2  ;;  %v1576_v6 = vpop.f32.mrf.mxu3 }
 0x552   :  { %v1582_v41 = vmul.f32 0.05, %v1563_v2  ;;  %v1583_v33 = vmul.f32 0.05, %v1576_v6 }
 0x553   :  { %v1537_v25 = vpop.f32.mrf.mxu0  ;;  %v1550_v58 = vpop.f32.mrf.mxu1 }
 0x554   :  { %v1586_v12 = vadd.f32 %v1582_v41, %v2703_v23  ;;  %v1587_v3 = vadd.f32 %v1583_v33, %v2701_v21  ;;  %v1580_v35 = vmul.f32 0.05, %v1537_v25  ;;  %v1581_v24 = vmul.f32 0.05, %v1550_v58 }
 0x556   :  { %v1590_v14 = vmul.f32 0.95238096, %v1586_v12  ;;  %v1591_v46 = vmul.f32 0.95238096, %v1587_v3  ;;  %v1584_v1 = vadd.f32 %v1580_v35, %v3318_v39  ;;  %v1585_v20 = vadd.f32 %v1581_v24, %v3319_v42 }
 0x558   :  { %1594 = vst [vmem:[%s3297_s6 + $0x10] sm:$0xff] %v1590_v14  ;;  %v1588_v47 = vmul.f32 0.95238096, %v1584_v1  ;;  %v1589_v28 = vmul.f32 0.95238096, %v1585_v20 }
 0x559   :  { %1595 = vst [vmem:[%s3297_s6 + $0x18] sm:$0xff] %v1591_v46  ;;  %v1565_v23 = vpop.f32.mrf.mxu2  ;;  %v1578_v21 = vpop.f32.mrf.mxu3 }
 0x55a   :  { %1592 = vst [vmem:[%s3297_s6] sm:$0xff] %v1588_v47 }
 0x55b   :  { %1593 = vst [vmem:[%s3297_s6 + $0x8] sm:$0xff] %v1589_v28  ;;  %v1539_v50 = vpop.f32.mrf.mxu0  ;;  %v1552_v31 = vpop.f32.mrf.mxu1 }

</bundles_post_ra>
